<compile_context>
chip_gen: v6e
topology: v6e:2x2x1
jax: 0.10.0
libtpu: 0.0.40
codegen_flags: <defaults>
</compile_context>

<pallas_src>
import math

import jax
import jax.numpy as jnp
import numpy as np
from jax.experimental import pallas as pl
from jax.experimental.pallas import tpu as pltpu


def _make_kernel(t_blk, B, H, D):
    """Build a SpatialLSTM kernel processing t_blk timesteps per grid step."""

    def kernel(x_ref, xp_ref, uah_ref, uac_ref, va_ref, w_ref, u_ref, b_ref,
               hseq_ref, h_out_ref, c_out_ref, alpha_out_ref,
               h_sc, c_sc):
        # Initialize recurrent carries on the first grid step.
        @pl.when(pl.program_id(0) == 0)
        def _():
            h_sc[...] = jnp.zeros_like(h_sc)
            c_sc[...] = jnp.zeros_like(c_sc)

        # --- loop-invariant loads / broadcasts, hoisted out of the loop ---
        ua_h = uah_ref[...]            # (H, D)   bf16
        ua_c = uac_ref[...]            # (H, D)   bf16
        va = va_ref[...]               # (D, D)   bf16
        w = w_ref[...]                 # (D, 4H)  bf16
        u = u_ref[...]                 # (H, 4H)  bf16
        bias = jnp.broadcast_to(b_ref[...], (B, 4 * H))   # (B, 4H) f32

        h = h_sc[...]                  # (B, H) f32
        c = c_sc[...]                  # (B, H) f32
        alpha = None
        hs = []

        # Fully unrolled inner loop (t_blk is small and static).
        for t in range(t_blk):
            x_t = x_ref[t]             # (B, D)  raw input, f32
            xp_t = xp_ref[t]           # (B, D)  precomputed x_t @ Wa + ba, f32

            h_bf = h.astype(jnp.bfloat16)
            c_bf = c.astype(jnp.bfloat16)

            # --- spatial attention: tanh(x@Wa + h@Ua_h + c@Ua_c + ba) @ Va ---
            pre = (xp_t
                   + jnp.dot(h_bf, ua_h, preferred_element_type=jnp.float32)
                   + jnp.dot(c_bf, ua_c, preferred_element_type=jnp.float32))
            a_t = jnp.dot(jnp.tanh(pre).astype(jnp.bfloat16), va,
                          preferred_element_type=jnp.float32)      # (B, D)

            # softmax over the feature dim (EUP reciprocal off the VPU path)
            a_max = jnp.max(a_t, axis=1, keepdims=True)
            e = jnp.exp(a_t - a_max)
            alpha = e * pl.reciprocal(jnp.sum(e, axis=1, keepdims=True),
                                      approx=True)                 # (B, D)

            # --- LSTM gates: (alpha*x) @ W + h @ U + bias (split dots) ---
            x_att = (alpha * x_t).astype(jnp.bfloat16)
            gates = (jnp.dot(x_att, w, preferred_element_type=jnp.float32)
                     + jnp.dot(h_bf, u, preferred_element_type=jnp.float32)
                     + bias)                                       # (B, 4H)

            sg = jax.nn.sigmoid(gates)       # full-width once
            i_t = sg[:, :H]
            f_t = sg[:, H:2 * H]
            o_t = sg[:, 3 * H:]
            g_t = jnp.tanh(gates[:, 2 * H:3 * H])

            c = f_t * c + i_t * g_t
            h = o_t * jnp.tanh(c)
            hs.append(h)

        # Carry state to the next grid step.
        h_sc[...] = h
        c_sc[...] = c

        # Lane-dense hidden_seq store: one unmasked (B, t_blk*H) store/block.
        hseq_ref[0] = jnp.concatenate(hs, axis=1)

        # Final-state outputs: write only once, on the last grid step.
        @pl.when(pl.program_id(0) == pl.num_programs(0) - 1)
        def _():
            h_out_ref[...] = h
            c_out_ref[...] = c
            alpha_out_ref[...] = alpha

    return kernel


def _pick_t_blk(S, cap=32):
    """Largest divisor of S not exceeding `cap` (bounds unroll size / VMEM)."""
    t = min(S, cap)
    while S % t != 0:
        t -= 1
    return t


def spatial_lstm(X, Wa, Ua, ba, Va, W, U, bias, *, t_blk=None):
    """Pallas SpatialLSTM forward.

    X: (B, S, D) float32. Returns (hidden_seq (B,S,H), (h_t, c_t), alpha_t)
    matching the PyTorch module.
    """
    B, S, D = X.shape
    H = U.shape[0]
    assert Ua.shape == (2 * H, D)

    if t_blk is None:
        t_blk = _pick_t_blk(S)
    assert S % t_blk == 0
    n_blk = S // t_blk

    X = X.astype(jnp.float32)
    # Hoisted input projection: no recurrence dependence, one big matmul.
    # TODO(synk): fold this per-block into the kernel for large S*B to drop
    # the second input stream (irrelevant at small sizes).
    Xp = (X.reshape(B * S, D) @ Wa + ba).reshape(B, S, D)

    Xk = jnp.transpose(X, (1, 0, 2)).astype(jnp.float32)     # (S, B, D)
    Xpk = jnp.transpose(Xp, (1, 0, 2)).astype(jnp.float32)   # (S, B, D)

    # Split weights (no in-kernel staging); bf16 MXU operands, f32 biases.
    Ua_h = Ua[:H].astype(jnp.bfloat16)                       # (H, D)
    Ua_c = Ua[H:].astype(jnp.bfloat16)                       # (H, D)
    Va_b = Va.astype(jnp.bfloat16)                           # (D, D)
    W_b = W.astype(jnp.bfloat16)                             # (D, 4H)
    U_b = U.astype(jnp.bfloat16)                             # (H, 4H)
    b2 = bias.reshape(1, 4 * H).astype(jnp.float32)

    def whole(shape):
        return pl.BlockSpec(shape, lambda i: (0, 0))

    grid_spec = pltpu.PrefetchScalarGridSpec(
        num_scalar_prefetch=0,
        grid=(n_blk,),
        in_specs=[
            pl.BlockSpec((t_blk, B, D), lambda i: (i, 0, 0)),   # X block
            pl.BlockSpec((t_blk, B, D), lambda i: (i, 0, 0)),   # X@Wa+ba block
            whole((H, D)),                                      # Ua_h
            whole((H, D)),                                      # Ua_c
            whole((D, D)),                                      # Va
            whole((D, 4 * H)),                                  # W
            whole((H, 4 * H)),                                  # U
            whole((1, 4 * H)),                                  # bias
        ],
        out_specs=[
            pl.BlockSpec((1, B, t_blk * H), lambda i: (i, 0, 0)),  # hidden blk
            whole((B, H)),                                         # h_t
            whole((B, H)),                                         # c_t
            whole((B, D)),                                         # alpha_t
        ],
        scratch_shapes=[
            pltpu.VMEM((B, H), jnp.float32),        # h carry
            pltpu.VMEM((B, H), jnp.float32),        # c carry
        ],
    )

    out_shapes = (
        jax.ShapeDtypeStruct((n_blk, B, t_blk * H), jnp.float32),
        jax.ShapeDtypeStruct((B, H), jnp.float32),
        jax.ShapeDtypeStruct((B, H), jnp.float32),
        jax.ShapeDtypeStruct((B, D), jnp.float32),
    )

    hseq_blk, h_t, c_t, alpha_t = pl.pallas_call(
        _make_kernel(t_blk, B, H, D),
        grid_spec=grid_spec,
        out_shape=out_shapes,
        compiler_params=pltpu.CompilerParams(
            dimension_semantics=("arbitrary",)),   # sequential recurrence
    )(Xk, Xpk, Ua_h, Ua_c, Va_b, W_b, U_b, b2)

    # Undo the lane-dense block layout: (n_blk, B, t_blk*H) -> (B, S, H).
    hidden_seq = (hseq_blk.reshape(n_blk, B, t_blk, H)
                  .transpose(1, 0, 2, 3)
                  .reshape(B, S, H))
    return hidden_seq, (h_t, c_t), alpha_t


def ref_spatial_lstm(X, Wa, Ua, ba, Va, W, U, bias):
    """Pure-JAX reference mirroring the PyTorch forward exactly."""
    B, S, D = X.shape
    H = U.shape[0]

    def step(carry, x_t):
        h, c = carry
        hc = jnp.concatenate([h, c], axis=1)
        a_t = jnp.tanh(x_t @ Wa + hc @ Ua + ba) @ Va
        alpha = jax.nn.softmax(a_t, axis=1)
        x_a = alpha * x_t
        gates = x_a @ W + h @ U + bias
        i_t = jax.nn.sigmoid(gates[:, :H])
        f_t = jax.nn.sigmoid(gates[:, H:2 * H])
        g_t = jnp.tanh(gates[:, 2 * H:3 * H])
        o_t = jax.nn.sigmoid(gates[:, 3 * H:])
        c = f_t * c + i_t * g_t
        h = o_t * jnp.tanh(c)
        return (h, c), (h, alpha)

    init = (jnp.zeros((B, H), jnp.float32), jnp.zeros((B, H), jnp.float32))
    (h, c), (hs, alphas) = jax.lax.scan(step, init, jnp.transpose(X, (1, 0, 2)))
    return jnp.transpose(hs, (1, 0, 2)), (h, c), alphas[-1]


if __name__ == "__main__":
    input_dim, hidden_dim = 16, 32
    batch, seq_len = 4, 8

    key = jax.random.PRNGKey(0)
    ks = jax.random.split(key, 8)
    stdv = 1.0 / math.sqrt(hidden_dim)

    def uni(k, shape):
        return jax.random.uniform(k, shape, jnp.float32, -stdv, stdv)

    W = uni(ks[0], (input_dim, hidden_dim * 4))
    U = uni(ks[1], (hidden_dim, hidden_dim * 4))
    bias = uni(ks[2], (hidden_dim * 4,))
    Wa = uni(ks[3], (input_dim, input_dim))
    Ua = uni(ks[4], (hidden_dim * 2, input_dim))
    ba = uni(ks[5], (input_dim,))
    Va = uni(ks[6], (input_dim, input_dim))
    X = jax.random.normal(ks[7], (batch, seq_len, input_dim), jnp.float32)

    hidden_seq, (h_t, c_t), alpha_t = spatial_lstm(X, Wa, Ua, ba, Va, W, U, bias)
    jax.block_until_ready(hidden_seq)

    ref_hseq, (ref_h, ref_c), ref_alpha = ref_spatial_lstm(
        X, Wa, Ua, ba, Va, W, U, bias)

    np.testing.assert_allclose(np.asarray(hidden_seq), np.asarray(ref_hseq),
                               atol=1e-2, rtol=1e-2)
    np.testing.assert_allclose(np.asarray(h_t), np.asarray(ref_h),
                               atol=1e-2, rtol=1e-2)
    np.testing.assert_allclose(np.asarray(c_t), np.asarray(ref_c),
                               atol=1e-2, rtol=1e-2)
    np.testing.assert_allclose(np.asarray(alpha_t), np.asarray(ref_alpha),
                               atol=1e-2, rtol=1e-2)

    assert hidden_seq.shape == (batch, seq_len, hidden_dim)
    assert h_t.shape == (batch, hidden_dim)
    assert c_t.shape == (batch, hidden_dim)
    assert alpha_t.shape == (batch, input_dim)

    print("KERNEL_OK")
</pallas_src>

<mosaic_0001>
module attributes {stable_mosaic.version = 11 : i64} {
  func.func @kernel(%arg0: i32, %arg1: memref<8x4x16xf32, #tpu.memory_space<vmem>>, %arg2: memref<8x4x16xf32, #tpu.memory_space<vmem>>, %arg3: memref<32x16xbf16, #tpu.memory_space<vmem>>, %arg4: memref<32x16xbf16, #tpu.memory_space<vmem>>, %arg5: memref<16x16xbf16, #tpu.memory_space<vmem>>, %arg6: memref<16x128xbf16, #tpu.memory_space<vmem>>, %arg7: memref<32x128xbf16, #tpu.memory_space<vmem>>, %arg8: memref<1x128xf32, #tpu.memory_space<vmem>>, %arg9: memref<1x4x256xf32, #tpu.memory_space<vmem>>, %arg10: memref<4x32xf32, #tpu.memory_space<vmem>>, %arg11: memref<4x32xf32, #tpu.memory_space<vmem>>, %arg12: memref<4x16xf32, #tpu.memory_space<vmem>>, %arg13: memref<4x32xf32, #tpu.memory_space<vmem>>, %arg14: memref<4x32xf32, #tpu.memory_space<vmem>>) attributes {dimension_semantics = [#tpu.dimension_semantics<arbitrary>], iteration_bounds = array<i64: 1>, scalar_prefetch = 0 : i64, scratch_operands = 2 : i64, tpu.core_type = #tpu.core_type<tc>, window_params = [{transform_indices = @transform_0, window_bounds = array<i64: 8, 4, 16>}, {transform_indices = @transform_1, window_bounds = array<i64: 8, 4, 16>}, {pipeline_mode = #tpu.pipeline_mode<synchronous>, transform_indices = @transform_2, window_bounds = array<i64: 32, 16>}, {pipeline_mode = #tpu.pipeline_mode<synchronous>, transform_indices = @transform_3, window_bounds = array<i64: 32, 16>}, {pipeline_mode = #tpu.pipeline_mode<synchronous>, transform_indices = @transform_4, window_bounds = array<i64: 16, 16>}, {pipeline_mode = #tpu.pipeline_mode<synchronous>, transform_indices = @transform_5, window_bounds = array<i64: 16, 128>}, {pipeline_mode = #tpu.pipeline_mode<synchronous>, transform_indices = @transform_6, window_bounds = array<i64: 32, 128>}, {pipeline_mode = #tpu.pipeline_mode<synchronous>, transform_indices = @transform_7, window_bounds = array<i64: 1, 128>}, {transform_indices = @transform_8, window_bounds = array<i64: 1, 4, 256>}, {pipeline_mode = #tpu.pipeline_mode<synchronous>, transform_indices = @transform_9, window_bounds = array<i64: 4, 32>}, {pipeline_mode = #tpu.pipeline_mode<synchronous>, transform_indices = @transform_10, window_bounds = array<i64: 4, 32>}, {pipeline_mode = #tpu.pipeline_mode<synchronous>, transform_indices = @transform_11, window_bounds = array<i64: 4, 16>}]} {
    %c0_i32 = arith.constant 0 : i32
    %0 = arith.cmpi eq, %arg0, %c0_i32 : i32
    %1 = arith.extui %0 : i1 to i32
    %c0_i32_0 = arith.constant 0 : i32
    %2 = arith.cmpi ne, %1, %c0_i32_0 : i32
    scf.if %2 {
      %cst_129 = arith.constant 0.000000e+00 : f32
      %374 = vector.broadcast %cst_129 : f32 to vector<4x32xf32>
      %c0_130 = arith.constant 0 : index
      %c0_131 = arith.constant 0 : index
      %375 = vector.load %arg13[%c0_130, %c0_131] : memref<4x32xf32, #tpu.memory_space<vmem>>, vector<4x32xf32>
      tpu.vector_store %arg13[%c0_130, %c0_131], %374 {strides = array<i32>} : memref<4x32xf32, #tpu.memory_space<vmem>>, vector<4x32xf32>,
      %cst_132 = arith.constant 0.000000e+00 : f32
      %376 = vector.broadcast %cst_132 : f32 to vector<4x32xf32>
      %c0_133 = arith.constant 0 : index
      %c0_134 = arith.constant 0 : index
      %377 = vector.load %arg14[%c0_133, %c0_134] : memref<4x32xf32, #tpu.memory_space<vmem>>, vector<4x32xf32>
      tpu.vector_store %arg14[%c0_133, %c0_134], %376 {strides = array<i32>} : memref<4x32xf32, #tpu.memory_space<vmem>>, vector<4x32xf32>,
    } else {
    }
    %c0 = arith.constant 0 : index
    %c0_1 = arith.constant 0 : index
    %3 = vector.load %arg3[%c0, %c0_1] : memref<32x16xbf16, #tpu.memory_space<vmem>>, vector<32x16xbf16>
    %c0_2 = arith.constant 0 : index
    %c0_3 = arith.constant 0 : index
    %4 = vector.load %arg4[%c0_2, %c0_3] : memref<32x16xbf16, #tpu.memory_space<vmem>>, vector<32x16xbf16>
    %c0_4 = arith.constant 0 : index
    %c0_5 = arith.constant 0 : index
    %5 = vector.load %arg5[%c0_4, %c0_5] : memref<16x16xbf16, #tpu.memory_space<vmem>>, vector<16x16xbf16>
    %c0_6 = arith.constant 0 : index
    %c0_7 = arith.constant 0 : index
    %6 = vector.load %arg6[%c0_6, %c0_7] : memref<16x128xbf16, #tpu.memory_space<vmem>>, vector<16x128xbf16>
    %c0_8 = arith.constant 0 : index
    %c0_9 = arith.constant 0 : index
    %7 = vector.load %arg7[%c0_8, %c0_9] : memref<32x128xbf16, #tpu.memory_space<vmem>>, vector<32x128xbf16>
    %c0_10 = arith.constant 0 : index
    %c0_11 = arith.constant 0 : index
    %8 = vector.load %arg8[%c0_10, %c0_11] : memref<1x128xf32, #tpu.memory_space<vmem>>, vector<1x128xf32>
    %9 = vector.shape_cast %8 : vector<1x128xf32> to vector<1x128xf32>
    %10 = vector.broadcast %9 : vector<1x128xf32> to vector<4x128xf32>
    %c0_12 = arith.constant 0 : index
    %c0_13 = arith.constant 0 : index
    %11 = vector.load %arg13[%c0_12, %c0_13] : memref<4x32xf32, #tpu.memory_space<vmem>>, vector<4x32xf32>
    %c0_14 = arith.constant 0 : index
    %c0_15 = arith.constant 0 : index
    %12 = vector.load %arg14[%c0_14, %c0_15] : memref<4x32xf32, #tpu.memory_space<vmem>>, vector<4x32xf32>
    %c0_16 = arith.constant 0 : index
    %c0_17 = arith.constant 0 : index
    %c0_18 = arith.constant 0 : index
    %13 = vector.load %arg1[%c0_16, %c0_17, %c0_18] : memref<8x4x16xf32, #tpu.memory_space<vmem>>, vector<1x4x16xf32>
    %14 = vector.shape_cast %13 : vector<1x4x16xf32> to vector<4x16xf32>
    %c0_19 = arith.constant 0 : index
    %c0_20 = arith.constant 0 : index
    %c0_21 = arith.constant 0 : index
    %15 = vector.load %arg2[%c0_19, %c0_20, %c0_21] : memref<8x4x16xf32, #tpu.memory_space<vmem>>, vector<1x4x16xf32>
    %16 = vector.shape_cast %15 : vector<1x4x16xf32> to vector<4x16xf32>
    %17 = arith.truncf %11 : vector<4x32xf32> to vector<4x32xbf16>
    %18 = arith.truncf %12 : vector<4x32xf32> to vector<4x32xbf16>
    %cst = arith.constant dense<0.000000e+00> : vector<4x16xf32>
    %19 = tpu.matmul %17, %3, %cst {dimension_numbers = #tpu.dot_dimension_numbers<[1], [0], [0], [1], [0, 0, 1, 1], [], []>} : vector<4x32xbf16>, vector<32x16xbf16>, vector<4x16xf32> -> vector<4x16xf32>
    %20 = arith.addf %16, %19 : vector<4x16xf32>
    %cst_22 = arith.constant dense<0.000000e+00> : vector<4x16xf32>
    %21 = tpu.matmul %18, %4, %cst_22 {dimension_numbers = #tpu.dot_dimension_numbers<[1], [0], [0], [1], [0, 0, 1, 1], [], []>} : vector<4x32xbf16>, vector<32x16xbf16>, vector<4x16xf32> -> vector<4x16xf32>
    %22 = arith.addf %20, %21 : vector<4x16xf32>
    %23 = math.tanh %22 : vector<4x16xf32>
    %24 = arith.truncf %23 : vector<4x16xf32> to vector<4x16xbf16>
    %cst_23 = arith.constant dense<0.000000e+00> : vector<4x16xf32>
    %25 = tpu.matmul %24, %5, %cst_23 {dimension_numbers = #tpu.dot_dimension_numbers<[1], [0], [0], [1], [0, 0, 1, 1], [], []>} : vector<4x16xbf16>, vector<16x16xbf16>, vector<4x16xf32> -> vector<4x16xf32>
    %cst_24 = arith.constant dense<0xFF800000> : vector<4xf32>
    %26 = vector.multi_reduction <maximumf>, %25, %cst_24 [1] : vector<4x16xf32> to vector<4xf32>
    %27 = vector.shape_cast %26 : vector<4xf32> to vector<4x1xf32>
    %28 = vector.broadcast %27 : vector<4x1xf32> to vector<4x16xf32>
    %29 = arith.subf %25, %28 : vector<4x16xf32>
    %30 = math.exp %29 : vector<4x16xf32>
    %cst_25 = arith.constant dense<0.000000e+00> : vector<4xf32>
    %31 = vector.multi_reduction <add>, %30, %cst_25 [1] : vector<4x16xf32> to vector<4xf32>
    %32 = vector.shape_cast %31 : vector<4xf32> to vector<4x1xf32>
    %33 = tpu.reciprocal %32 {approx = true} : vector<4x1xf32> -> vector<4x1xf32>
    %34 = vector.broadcast %33 : vector<4x1xf32> to vector<4x16xf32>
    %35 = arith.mulf %30, %34 : vector<4x16xf32>
    %36 = arith.mulf %35, %14 : vector<4x16xf32>
    %37 = arith.truncf %36 : vector<4x16xf32> to vector<4x16xbf16>
    %cst_26 = arith.constant dense<0.000000e+00> : vector<4x128xf32>
    %38 = tpu.matmul %37, %6, %cst_26 {dimension_numbers = #tpu.dot_dimension_numbers<[1], [0], [0], [1], [0, 0, 1, 1], [], []>} : vector<4x16xbf16>, vector<16x128xbf16>, vector<4x128xf32> -> vector<4x128xf32>
    %cst_27 = arith.constant dense<0.000000e+00> : vector<4x128xf32>
    %39 = tpu.matmul %17, %7, %cst_27 {dimension_numbers = #tpu.dot_dimension_numbers<[1], [0], [0], [1], [0, 0, 1, 1], [], []>} : vector<4x32xbf16>, vector<32x128xbf16>, vector<4x128xf32> -> vector<4x128xf32>
    %40 = arith.addf %38, %39 : vector<4x128xf32>
    %41 = arith.addf %40, %10 : vector<4x128xf32>
    %42 = arith.negf %41 : vector<4x128xf32>
    %43 = math.exp %42 : vector<4x128xf32>
    %cst_28 = arith.constant 1.000000e+00 : f32
    %44 = vector.broadcast %cst_28 : f32 to vector<4x128xf32>
    %45 = arith.addf %44, %43 : vector<4x128xf32>
    %46 = arith.divf %44, %45 : vector<4x128xf32>
    %47 = vector.extract_strided_slice %46 {offsets = [0, 0], sizes = [4, 32], strides = [1, 1]} : vector<4x128xf32> to vector<4x32xf32>
    %48 = vector.extract_strided_slice %46 {offsets = [0, 32], sizes = [4, 32], strides = [1, 1]} : vector<4x128xf32> to vector<4x32xf32>
    %49 = vector.extract_strided_slice %46 {offsets = [0, 96], sizes = [4, 32], strides = [1, 1]} : vector<4x128xf32> to vector<4x32xf32>
    %50 = vector.extract_strided_slice %41 {offsets = [0, 64], sizes = [4, 32], strides = [1, 1]} : vector<4x128xf32> to vector<4x32xf32>
    %51 = math.tanh %50 : vector<4x32xf32>
    %52 = arith.mulf %48, %12 : vector<4x32xf32>
    %53 = arith.mulf %47, %51 : vector<4x32xf32>
    %54 = arith.addf %52, %53 : vector<4x32xf32>
    %55 = math.tanh %54 : vector<4x32xf32>
    %56 = arith.mulf %49, %55 : vector<4x32xf32>
    %c1 = arith.constant 1 : index
    %c0_29 = arith.constant 0 : index
    %c0_30 = arith.constant 0 : index
    %57 = vector.load %arg1[%c1, %c0_29, %c0_30] : memref<8x4x16xf32, #tpu.memory_space<vmem>>, vector<1x4x16xf32>
    %58 = vector.shape_cast %57 : vector<1x4x16xf32> to vector<4x16xf32>
    %c1_31 = arith.constant 1 : index
    %c0_32 = arith.constant 0 : index
    %c0_33 = arith.constant 0 : index
    %59 = vector.load %arg2[%c1_31, %c0_32, %c0_33] : memref<8x4x16xf32, #tpu.memory_space<vmem>>, vector<1x4x16xf32>
    %60 = vector.shape_cast %59 : vector<1x4x16xf32> to vector<4x16xf32>
    %61 = arith.truncf %56 : vector<4x32xf32> to vector<4x32xbf16>
    %62 = arith.truncf %54 : vector<4x32xf32> to vector<4x32xbf16>
    %cst_34 = arith.constant dense<0.000000e+00> : vector<4x16xf32>
    %63 = tpu.matmul %61, %3, %cst_34 {dimension_numbers = #tpu.dot_dimension_numbers<[1], [0], [0], [1], [0, 0, 1, 1], [], []>} : vector<4x32xbf16>, vector<32x16xbf16>, vector<4x16xf32> -> vector<4x16xf32>
    %64 = arith.addf %60, %63 : vector<4x16xf32>
    %cst_35 = arith.constant dense<0.000000e+00> : vector<4x16xf32>
    %65 = tpu.matmul %62, %4, %cst_35 {dimension_numbers = #tpu.dot_dimension_numbers<[1], [0], [0], [1], [0, 0, 1, 1], [], []>} : vector<4x32xbf16>, vector<32x16xbf16>, vector<4x16xf32> -> vector<4x16xf32>
    %66 = arith.addf %64, %65 : vector<4x16xf32>
    %67 = math.tanh %66 : vector<4x16xf32>
    %68 = arith.truncf %67 : vector<4x16xf32> to vector<4x16xbf16>
    %cst_36 = arith.constant dense<0.000000e+00> : vector<4x16xf32>
    %69 = tpu.matmul %68, %5, %cst_36 {dimension_numbers = #tpu.dot_dimension_numbers<[1], [0], [0], [1], [0, 0, 1, 1], [], []>} : vector<4x16xbf16>, vector<16x16xbf16>, vector<4x16xf32> -> vector<4x16xf32>
    %cst_37 = arith.constant dense<0xFF800000> : vector<4xf32>
    %70 = vector.multi_reduction <maximumf>, %69, %cst_37 [1] : vector<4x16xf32> to vector<4xf32>
    %71 = vector.shape_cast %70 : vector<4xf32> to vector<4x1xf32>
    %72 = vector.broadcast %71 : vector<4x1xf32> to vector<4x16xf32>
    %73 = arith.subf %69, %72 : vector<4x16xf32>
    %74 = math.exp %73 : vector<4x16xf32>
    %cst_38 = arith.constant dense<0.000000e+00> : vector<4xf32>
    %75 = vector.multi_reduction <add>, %74, %cst_38 [1] : vector<4x16xf32> to vector<4xf32>
    %76 = vector.shape_cast %75 : vector<4xf32> to vector<4x1xf32>
    %77 = tpu.reciprocal %76 {approx = true} : vector<4x1xf32> -> vector<4x1xf32>
    %78 = vector.broadcast %77 : vector<4x1xf32> to vector<4x16xf32>
    %79 = arith.mulf %74, %78 : vector<4x16xf32>
    %80 = arith.mulf %79, %58 : vector<4x16xf32>
    %81 = arith.truncf %80 : vector<4x16xf32> to vector<4x16xbf16>
    %cst_39 = arith.constant dense<0.000000e+00> : vector<4x128xf32>
    %82 = tpu.matmul %81, %6, %cst_39 {dimension_numbers = #tpu.dot_dimension_numbers<[1], [0], [0], [1], [0, 0, 1, 1], [], []>} : vector<4x16xbf16>, vector<16x128xbf16>, vector<4x128xf32> -> vector<4x128xf32>
    %cst_40 = arith.constant dense<0.000000e+00> : vector<4x128xf32>
    %83 = tpu.matmul %61, %7, %cst_40 {dimension_numbers = #tpu.dot_dimension_numbers<[1], [0], [0], [1], [0, 0, 1, 1], [], []>} : vector<4x32xbf16>, vector<32x128xbf16>, vector<4x128xf32> -> vector<4x128xf32>
    %84 = arith.addf %82, %83 : vector<4x128xf32>
    %85 = arith.addf %84, %10 : vector<4x128xf32>
    %86 = arith.negf %85 : vector<4x128xf32>
    %87 = math.exp %86 : vector<4x128xf32>
    %cst_41 = arith.constant 1.000000e+00 : f32
    %88 = vector.broadcast %cst_41 : f32 to vector<4x128xf32>
    %89 = arith.addf %88, %87 : vector<4x128xf32>
    %90 = arith.divf %88, %89 : vector<4x128xf32>
    %91 = vector.extract_strided_slice %90 {offsets = [0, 0], sizes = [4, 32], strides = [1, 1]} : vector<4x128xf32> to vector<4x32xf32>
    %92 = vector.extract_strided_slice %90 {offsets = [0, 32], sizes = [4, 32], strides = [1, 1]} : vector<4x128xf32> to vector<4x32xf32>
    %93 = vector.extract_strided_slice %90 {offsets = [0, 96], sizes = [4, 32], strides = [1, 1]} : vector<4x128xf32> to vector<4x32xf32>
    %94 = vector.extract_strided_slice %85 {offsets = [0, 64], sizes = [4, 32], strides = [1, 1]} : vector<4x128xf32> to vector<4x32xf32>
    %95 = math.tanh %94 : vector<4x32xf32>
    %96 = arith.mulf %92, %54 : vector<4x32xf32>
    %97 = arith.mulf %91, %95 : vector<4x32xf32>
    %98 = arith.addf %96, %97 : vector<4x32xf32>
    %99 = math.tanh %98 : vector<4x32xf32>
    %100 = arith.mulf %93, %99 : vector<4x32xf32>
    %c2 = arith.constant 2 : index
    %c0_42 = arith.constant 0 : index
    %c0_43 = arith.constant 0 : index
    %101 = vector.load %arg1[%c2, %c0_42, %c0_43] : memref<8x4x16xf32, #tpu.memory_space<vmem>>, vector<1x4x16xf32>
    %102 = vector.shape_cast %101 : vector<1x4x16xf32> to vector<4x16xf32>
    %c2_44 = arith.constant 2 : index
    %c0_45 = arith.constant 0 : index
    %c0_46 = arith.constant 0 : index
    %103 = vector.load %arg2[%c2_44, %c0_45, %c0_46] : memref<8x4x16xf32, #tpu.memory_space<vmem>>, vector<1x4x16xf32>
    %104 = vector.shape_cast %103 : vector<1x4x16xf32> to vector<4x16xf32>
    %105 = arith.truncf %100 : vector<4x32xf32> to vector<4x32xbf16>
    %106 = arith.truncf %98 : vector<4x32xf32> to vector<4x32xbf16>
    %cst_47 = arith.constant dense<0.000000e+00> : vector<4x16xf32>
    %107 = tpu.matmul %105, %3, %cst_47 {dimension_numbers = #tpu.dot_dimension_numbers<[1], [0], [0], [1], [0, 0, 1, 1], [], []>} : vector<4x32xbf16>, vector<32x16xbf16>, vector<4x16xf32> -> vector<4x16xf32>
    %108 = arith.addf %104, %107 : vector<4x16xf32>
    %cst_48 = arith.constant dense<0.000000e+00> : vector<4x16xf32>
    %109 = tpu.matmul %106, %4, %cst_48 {dimension_numbers = #tpu.dot_dimension_numbers<[1], [0], [0], [1], [0, 0, 1, 1], [], []>} : vector<4x32xbf16>, vector<32x16xbf16>, vector<4x16xf32> -> vector<4x16xf32>
    %110 = arith.addf %108, %109 : vector<4x16xf32>
    %111 = math.tanh %110 : vector<4x16xf32>
    %112 = arith.truncf %111 : vector<4x16xf32> to vector<4x16xbf16>
    %cst_49 = arith.constant dense<0.000000e+00> : vector<4x16xf32>
    %113 = tpu.matmul %112, %5, %cst_49 {dimension_numbers = #tpu.dot_dimension_numbers<[1], [0], [0], [1], [0, 0, 1, 1], [], []>} : vector<4x16xbf16>, vector<16x16xbf16>, vector<4x16xf32> -> vector<4x16xf32>
    %cst_50 = arith.constant dense<0xFF800000> : vector<4xf32>
    %114 = vector.multi_reduction <maximumf>, %113, %cst_50 [1] : vector<4x16xf32> to vector<4xf32>
    %115 = vector.shape_cast %114 : vector<4xf32> to vector<4x1xf32>
    %116 = vector.broadcast %115 : vector<4x1xf32> to vector<4x16xf32>
    %117 = arith.subf %113, %116 : vector<4x16xf32>
    %118 = math.exp %117 : vector<4x16xf32>
    %cst_51 = arith.constant dense<0.000000e+00> : vector<4xf32>
    %119 = vector.multi_reduction <add>, %118, %cst_51 [1] : vector<4x16xf32> to vector<4xf32>
    %120 = vector.shape_cast %119 : vector<4xf32> to vector<4x1xf32>
    %121 = tpu.reciprocal %120 {approx = true} : vector<4x1xf32> -> vector<4x1xf32>
    %122 = vector.broadcast %121 : vector<4x1xf32> to vector<4x16xf32>
    %123 = arith.mulf %118, %122 : vector<4x16xf32>
    %124 = arith.mulf %123, %102 : vector<4x16xf32>
    %125 = arith.truncf %124 : vector<4x16xf32> to vector<4x16xbf16>
    %cst_52 = arith.constant dense<0.000000e+00> : vector<4x128xf32>
    %126 = tpu.matmul %125, %6, %cst_52 {dimension_numbers = #tpu.dot_dimension_numbers<[1], [0], [0], [1], [0, 0, 1, 1], [], []>} : vector<4x16xbf16>, vector<16x128xbf16>, vector<4x128xf32> -> vector<4x128xf32>
    %cst_53 = arith.constant dense<0.000000e+00> : vector<4x128xf32>
    %127 = tpu.matmul %105, %7, %cst_53 {dimension_numbers = #tpu.dot_dimension_numbers<[1], [0], [0], [1], [0, 0, 1, 1], [], []>} : vector<4x32xbf16>, vector<32x128xbf16>, vector<4x128xf32> -> vector<4x128xf32>
    %128 = arith.addf %126, %127 : vector<4x128xf32>
    %129 = arith.addf %128, %10 : vector<4x128xf32>
    %130 = arith.negf %129 : vector<4x128xf32>
    %131 = math.exp %130 : vector<4x128xf32>
    %cst_54 = arith.constant 1.000000e+00 : f32
    %132 = vector.broadcast %cst_54 : f32 to vector<4x128xf32>
    %133 = arith.addf %132, %131 : vector<4x128xf32>
    %134 = arith.divf %132, %133 : vector<4x128xf32>
    %135 = vector.extract_strided_slice %134 {offsets = [0, 0], sizes = [4, 32], strides = [1, 1]} : vector<4x128xf32> to vector<4x32xf32>
    %136 = vector.extract_strided_slice %134 {offsets = [0, 32], sizes = [4, 32], strides = [1, 1]} : vector<4x128xf32> to vector<4x32xf32>
    %137 = vector.extract_strided_slice %134 {offsets = [0, 96], sizes = [4, 32], strides = [1, 1]} : vector<4x128xf32> to vector<4x32xf32>
    %138 = vector.extract_strided_slice %129 {offsets = [0, 64], sizes = [4, 32], strides = [1, 1]} : vector<4x128xf32> to vector<4x32xf32>
    %139 = math.tanh %138 : vector<4x32xf32>
    %140 = arith.mulf %136, %98 : vector<4x32xf32>
    %141 = arith.mulf %135, %139 : vector<4x32xf32>
    %142 = arith.addf %140, %141 : vector<4x32xf32>
    %143 = math.tanh %142 : vector<4x32xf32>
    %144 = arith.mulf %137, %143 : vector<4x32xf32>
    %c3 = arith.constant 3 : index
    %c0_55 = arith.constant 0 : index
    %c0_56 = arith.constant 0 : index
    %145 = vector.load %arg1[%c3, %c0_55, %c0_56] : memref<8x4x16xf32, #tpu.memory_space<vmem>>, vector<1x4x16xf32>
    %146 = vector.shape_cast %145 : vector<1x4x16xf32> to vector<4x16xf32>
    %c3_57 = arith.constant 3 : index
    %c0_58 = arith.constant 0 : index
    %c0_59 = arith.constant 0 : index
    %147 = vector.load %arg2[%c3_57, %c0_58, %c0_59] : memref<8x4x16xf32, #tpu.memory_space<vmem>>, vector<1x4x16xf32>
    %148 = vector.shape_cast %147 : vector<1x4x16xf32> to vector<4x16xf32>
    %149 = arith.truncf %144 : vector<4x32xf32> to vector<4x32xbf16>
    %150 = arith.truncf %142 : vector<4x32xf32> to vector<4x32xbf16>
    %cst_60 = arith.constant dense<0.000000e+00> : vector<4x16xf32>
    %151 = tpu.matmul %149, %3, %cst_60 {dimension_numbers = #tpu.dot_dimension_numbers<[1], [0], [0], [1], [0, 0, 1, 1], [], []>} : vector<4x32xbf16>, vector<32x16xbf16>, vector<4x16xf32> -> vector<4x16xf32>
    %152 = arith.addf %148, %151 : vector<4x16xf32>
    %cst_61 = arith.constant dense<0.000000e+00> : vector<4x16xf32>
    %153 = tpu.matmul %150, %4, %cst_61 {dimension_numbers = #tpu.dot_dimension_numbers<[1], [0], [0], [1], [0, 0, 1, 1], [], []>} : vector<4x32xbf16>, vector<32x16xbf16>, vector<4x16xf32> -> vector<4x16xf32>
    %154 = arith.addf %152, %153 : vector<4x16xf32>
    %155 = math.tanh %154 : vector<4x16xf32>
    %156 = arith.truncf %155 : vector<4x16xf32> to vector<4x16xbf16>
    %cst_62 = arith.constant dense<0.000000e+00> : vector<4x16xf32>
    %157 = tpu.matmul %156, %5, %cst_62 {dimension_numbers = #tpu.dot_dimension_numbers<[1], [0], [0], [1], [0, 0, 1, 1], [], []>} : vector<4x16xbf16>, vector<16x16xbf16>, vector<4x16xf32> -> vector<4x16xf32>
    %cst_63 = arith.constant dense<0xFF800000> : vector<4xf32>
    %158 = vector.multi_reduction <maximumf>, %157, %cst_63 [1] : vector<4x16xf32> to vector<4xf32>
    %159 = vector.shape_cast %158 : vector<4xf32> to vector<4x1xf32>
    %160 = vector.broadcast %159 : vector<4x1xf32> to vector<4x16xf32>
    %161 = arith.subf %157, %160 : vector<4x16xf32>
    %162 = math.exp %161 : vector<4x16xf32>
    %cst_64 = arith.constant dense<0.000000e+00> : vector<4xf32>
    %163 = vector.multi_reduction <add>, %162, %cst_64 [1] : vector<4x16xf32> to vector<4xf32>
    %164 = vector.shape_cast %163 : vector<4xf32> to vector<4x1xf32>
    %165 = tpu.reciprocal %164 {approx = true} : vector<4x1xf32> -> vector<4x1xf32>
    %166 = vector.broadcast %165 : vector<4x1xf32> to vector<4x16xf32>
    %167 = arith.mulf %162, %166 : vector<4x16xf32>
    %168 = arith.mulf %167, %146 : vector<4x16xf32>
    %169 = arith.truncf %168 : vector<4x16xf32> to vector<4x16xbf16>
    %cst_65 = arith.constant dense<0.000000e+00> : vector<4x128xf32>
    %170 = tpu.matmul %169, %6, %cst_65 {dimension_numbers = #tpu.dot_dimension_numbers<[1], [0], [0], [1], [0, 0, 1, 1], [], []>} : vector<4x16xbf16>, vector<16x128xbf16>, vector<4x128xf32> -> vector<4x128xf32>
    %cst_66 = arith.constant dense<0.000000e+00> : vector<4x128xf32>
    %171 = tpu.matmul %149, %7, %cst_66 {dimension_numbers = #tpu.dot_dimension_numbers<[1], [0], [0], [1], [0, 0, 1, 1], [], []>} : vector<4x32xbf16>, vector<32x128xbf16>, vector<4x128xf32> -> vector<4x128xf32>
    %172 = arith.addf %170, %171 : vector<4x128xf32>
    %173 = arith.addf %172, %10 : vector<4x128xf32>
    %174 = arith.negf %173 : vector<4x128xf32>
    %175 = math.exp %174 : vector<4x128xf32>
    %cst_67 = arith.constant 1.000000e+00 : f32
    %176 = vector.broadcast %cst_67 : f32 to vector<4x128xf32>
    %177 = arith.addf %176, %175 : vector<4x128xf32>
    %178 = arith.divf %176, %177 : vector<4x128xf32>
    %179 = vector.extract_strided_slice %178 {offsets = [0, 0], sizes = [4, 32], strides = [1, 1]} : vector<4x128xf32> to vector<4x32xf32>
    %180 = vector.extract_strided_slice %178 {offsets = [0, 32], sizes = [4, 32], strides = [1, 1]} : vector<4x128xf32> to vector<4x32xf32>
    %181 = vector.extract_strided_slice %178 {offsets = [0, 96], sizes = [4, 32], strides = [1, 1]} : vector<4x128xf32> to vector<4x32xf32>
    %182 = vector.extract_strided_slice %173 {offsets = [0, 64], sizes = [4, 32], strides = [1, 1]} : vector<4x128xf32> to vector<4x32xf32>
    %183 = math.tanh %182 : vector<4x32xf32>
    %184 = arith.mulf %180, %142 : vector<4x32xf32>
    %185 = arith.mulf %179, %183 : vector<4x32xf32>
    %186 = arith.addf %184, %185 : vector<4x32xf32>
    %187 = math.tanh %186 : vector<4x32xf32>
    %188 = arith.mulf %181, %187 : vector<4x32xf32>
    %c4 = arith.constant 4 : index
    %c0_68 = arith.constant 0 : index
    %c0_69 = arith.constant 0 : index
    %189 = vector.load %arg1[%c4, %c0_68, %c0_69] : memref<8x4x16xf32, #tpu.memory_space<vmem>>, vector<1x4x16xf32>
    %190 = vector.shape_cast %189 : vector<1x4x16xf32> to vector<4x16xf32>
    %c4_70 = arith.constant 4 : index
    %c0_71 = arith.constant 0 : index
    %c0_72 = arith.constant 0 : index
    %191 = vector.load %arg2[%c4_70, %c0_71, %c0_72] : memref<8x4x16xf32, #tpu.memory_space<vmem>>, vector<1x4x16xf32>
    %192 = vector.shape_cast %191 : vector<1x4x16xf32> to vector<4x16xf32>
    %193 = arith.truncf %188 : vector<4x32xf32> to vector<4x32xbf16>
    %194 = arith.truncf %186 : vector<4x32xf32> to vector<4x32xbf16>
    %cst_73 = arith.constant dense<0.000000e+00> : vector<4x16xf32>
    %195 = tpu.matmul %193, %3, %cst_73 {dimension_numbers = #tpu.dot_dimension_numbers<[1], [0], [0], [1], [0, 0, 1, 1], [], []>} : vector<4x32xbf16>, vector<32x16xbf16>, vector<4x16xf32> -> vector<4x16xf32>
    %196 = arith.addf %192, %195 : vector<4x16xf32>
    %cst_74 = arith.constant dense<0.000000e+00> : vector<4x16xf32>
    %197 = tpu.matmul %194, %4, %cst_74 {dimension_numbers = #tpu.dot_dimension_numbers<[1], [0], [0], [1], [0, 0, 1, 1], [], []>} : vector<4x32xbf16>, vector<32x16xbf16>, vector<4x16xf32> -> vector<4x16xf32>
    %198 = arith.addf %196, %197 : vector<4x16xf32>
    %199 = math.tanh %198 : vector<4x16xf32>
    %200 = arith.truncf %199 : vector<4x16xf32> to vector<4x16xbf16>
    %cst_75 = arith.constant dense<0.000000e+00> : vector<4x16xf32>
    %201 = tpu.matmul %200, %5, %cst_75 {dimension_numbers = #tpu.dot_dimension_numbers<[1], [0], [0], [1], [0, 0, 1, 1], [], []>} : vector<4x16xbf16>, vector<16x16xbf16>, vector<4x16xf32> -> vector<4x16xf32>
    %cst_76 = arith.constant dense<0xFF800000> : vector<4xf32>
    %202 = vector.multi_reduction <maximumf>, %201, %cst_76 [1] : vector<4x16xf32> to vector<4xf32>
    %203 = vector.shape_cast %202 : vector<4xf32> to vector<4x1xf32>
    %204 = vector.broadcast %203 : vector<4x1xf32> to vector<4x16xf32>
    %205 = arith.subf %201, %204 : vector<4x16xf32>
    %206 = math.exp %205 : vector<4x16xf32>
    %cst_77 = arith.constant dense<0.000000e+00> : vector<4xf32>
    %207 = vector.multi_reduction <add>, %206, %cst_77 [1] : vector<4x16xf32> to vector<4xf32>
    %208 = vector.shape_cast %207 : vector<4xf32> to vector<4x1xf32>
    %209 = tpu.reciprocal %208 {approx = true} : vector<4x1xf32> -> vector<4x1xf32>
    %210 = vector.broadcast %209 : vector<4x1xf32> to vector<4x16xf32>
    %211 = arith.mulf %206, %210 : vector<4x16xf32>
    %212 = arith.mulf %211, %190 : vector<4x16xf32>
    %213 = arith.truncf %212 : vector<4x16xf32> to vector<4x16xbf16>
    %cst_78 = arith.constant dense<0.000000e+00> : vector<4x128xf32>
    %214 = tpu.matmul %213, %6, %cst_78 {dimension_numbers = #tpu.dot_dimension_numbers<[1], [0], [0], [1], [0, 0, 1, 1], [], []>} : vector<4x16xbf16>, vector<16x128xbf16>, vector<4x128xf32> -> vector<4x128xf32>
    %cst_79 = arith.constant dense<0.000000e+00> : vector<4x128xf32>
    %215 = tpu.matmul %193, %7, %cst_79 {dimension_numbers = #tpu.dot_dimension_numbers<[1], [0], [0], [1], [0, 0, 1, 1], [], []>} : vector<4x32xbf16>, vector<32x128xbf16>, vector<4x128xf32> -> vector<4x128xf32>
    %216 = arith.addf %214, %215 : vector<4x128xf32>
    %217 = arith.addf %216, %10 : vector<4x128xf32>
    %218 = arith.negf %217 : vector<4x128xf32>
    %219 = math.exp %218 : vector<4x128xf32>
    %cst_80 = arith.constant 1.000000e+00 : f32
    %220 = vector.broadcast %cst_80 : f32 to vector<4x128xf32>
    %221 = arith.addf %220, %219 : vector<4x128xf32>
    %222 = arith.divf %220, %221 : vector<4x128xf32>
    %223 = vector.extract_strided_slice %222 {offsets = [0, 0], sizes = [4, 32], strides = [1, 1]} : vector<4x128xf32> to vector<4x32xf32>
    %224 = vector.extract_strided_slice %222 {offsets = [0, 32], sizes = [4, 32], strides = [1, 1]} : vector<4x128xf32> to vector<4x32xf32>
    %225 = vector.extract_strided_slice %222 {offsets = [0, 96], sizes = [4, 32], strides = [1, 1]} : vector<4x128xf32> to vector<4x32xf32>
    %226 = vector.extract_strided_slice %217 {offsets = [0, 64], sizes = [4, 32], strides = [1, 1]} : vector<4x128xf32> to vector<4x32xf32>
    %227 = math.tanh %226 : vector<4x32xf32>
    %228 = arith.mulf %224, %186 : vector<4x32xf32>
    %229 = arith.mulf %223, %227 : vector<4x32xf32>
    %230 = arith.addf %228, %229 : vector<4x32xf32>
    %231 = math.tanh %230 : vector<4x32xf32>
    %232 = arith.mulf %225, %231 : vector<4x32xf32>
    %c5 = arith.constant 5 : index
    %c0_81 = arith.constant 0 : index
    %c0_82 = arith.constant 0 : index
    %233 = vector.load %arg1[%c5, %c0_81, %c0_82] : memref<8x4x16xf32, #tpu.memory_space<vmem>>, vector<1x4x16xf32>
    %234 = vector.shape_cast %233 : vector<1x4x16xf32> to vector<4x16xf32>
    %c5_83 = arith.constant 5 : index
    %c0_84 = arith.constant 0 : index
    %c0_85 = arith.constant 0 : index
    %235 = vector.load %arg2[%c5_83, %c0_84, %c0_85] : memref<8x4x16xf32, #tpu.memory_space<vmem>>, vector<1x4x16xf32>
    %236 = vector.shape_cast %235 : vector<1x4x16xf32> to vector<4x16xf32>
    %237 = arith.truncf %232 : vector<4x32xf32> to vector<4x32xbf16>
    %238 = arith.truncf %230 : vector<4x32xf32> to vector<4x32xbf16>
    %cst_86 = arith.constant dense<0.000000e+00> : vector<4x16xf32>
    %239 = tpu.matmul %237, %3, %cst_86 {dimension_numbers = #tpu.dot_dimension_numbers<[1], [0], [0], [1], [0, 0, 1, 1], [], []>} : vector<4x32xbf16>, vector<32x16xbf16>, vector<4x16xf32> -> vector<4x16xf32>
    %240 = arith.addf %236, %239 : vector<4x16xf32>
    %cst_87 = arith.constant dense<0.000000e+00> : vector<4x16xf32>
    %241 = tpu.matmul %238, %4, %cst_87 {dimension_numbers = #tpu.dot_dimension_numbers<[1], [0], [0], [1], [0, 0, 1, 1], [], []>} : vector<4x32xbf16>, vector<32x16xbf16>, vector<4x16xf32> -> vector<4x16xf32>
    %242 = arith.addf %240, %241 : vector<4x16xf32>
    %243 = math.tanh %242 : vector<4x16xf32>
    %244 = arith.truncf %243 : vector<4x16xf32> to vector<4x16xbf16>
    %cst_88 = arith.constant dense<0.000000e+00> : vector<4x16xf32>
    %245 = tpu.matmul %244, %5, %cst_88 {dimension_numbers = #tpu.dot_dimension_numbers<[1], [0], [0], [1], [0, 0, 1, 1], [], []>} : vector<4x16xbf16>, vector<16x16xbf16>, vector<4x16xf32> -> vector<4x16xf32>
    %cst_89 = arith.constant dense<0xFF800000> : vector<4xf32>
    %246 = vector.multi_reduction <maximumf>, %245, %cst_89 [1] : vector<4x16xf32> to vector<4xf32>
    %247 = vector.shape_cast %246 : vector<4xf32> to vector<4x1xf32>
    %248 = vector.broadcast %247 : vector<4x1xf32> to vector<4x16xf32>
    %249 = arith.subf %245, %248 : vector<4x16xf32>
    %250 = math.exp %249 : vector<4x16xf32>
    %cst_90 = arith.constant dense<0.000000e+00> : vector<4xf32>
    %251 = vector.multi_reduction <add>, %250, %cst_90 [1] : vector<4x16xf32> to vector<4xf32>
    %252 = vector.shape_cast %251 : vector<4xf32> to vector<4x1xf32>
    %253 = tpu.reciprocal %252 {approx = true} : vector<4x1xf32> -> vector<4x1xf32>
    %254 = vector.broadcast %253 : vector<4x1xf32> to vector<4x16xf32>
    %255 = arith.mulf %250, %254 : vector<4x16xf32>
    %256 = arith.mulf %255, %234 : vector<4x16xf32>
    %257 = arith.truncf %256 : vector<4x16xf32> to vector<4x16xbf16>
    %cst_91 = arith.constant dense<0.000000e+00> : vector<4x128xf32>
    %258 = tpu.matmul %257, %6, %cst_91 {dimension_numbers = #tpu.dot_dimension_numbers<[1], [0], [0], [1], [0, 0, 1, 1], [], []>} : vector<4x16xbf16>, vector<16x128xbf16>, vector<4x128xf32> -> vector<4x128xf32>
    %cst_92 = arith.constant dense<0.000000e+00> : vector<4x128xf32>
    %259 = tpu.matmul %237, %7, %cst_92 {dimension_numbers = #tpu.dot_dimension_numbers<[1], [0], [0], [1], [0, 0, 1, 1], [], []>} : vector<4x32xbf16>, vector<32x128xbf16>, vector<4x128xf32> -> vector<4x128xf32>
    %260 = arith.addf %258, %259 : vector<4x128xf32>
    %261 = arith.addf %260, %10 : vector<4x128xf32>
    %262 = arith.negf %261 : vector<4x128xf32>
    %263 = math.exp %262 : vector<4x128xf32>
    %cst_93 = arith.constant 1.000000e+00 : f32
    %264 = vector.broadcast %cst_93 : f32 to vector<4x128xf32>
    %265 = arith.addf %264, %263 : vector<4x128xf32>
    %266 = arith.divf %264, %265 : vector<4x128xf32>
    %267 = vector.extract_strided_slice %266 {offsets = [0, 0], sizes = [4, 32], strides = [1, 1]} : vector<4x128xf32> to vector<4x32xf32>
    %268 = vector.extract_strided_slice %266 {offsets = [0, 32], sizes = [4, 32], strides = [1, 1]} : vector<4x128xf32> to vector<4x32xf32>
    %269 = vector.extract_strided_slice %266 {offsets = [0, 96], sizes = [4, 32], strides = [1, 1]} : vector<4x128xf32> to vector<4x32xf32>
    %270 = vector.extract_strided_slice %261 {offsets = [0, 64], sizes = [4, 32], strides = [1, 1]} : vector<4x128xf32> to vector<4x32xf32>
    %271 = math.tanh %270 : vector<4x32xf32>
    %272 = arith.mulf %268, %230 : vector<4x32xf32>
    %273 = arith.mulf %267, %271 : vector<4x32xf32>
    %274 = arith.addf %272, %273 : vector<4x32xf32>
    %275 = math.tanh %274 : vector<4x32xf32>
    %276 = arith.mulf %269, %275 : vector<4x32xf32>
    %c6 = arith.constant 6 : index
    %c0_94 = arith.constant 0 : index
    %c0_95 = arith.constant 0 : index
    %277 = vector.load %arg1[%c6, %c0_94, %c0_95] : memref<8x4x16xf32, #tpu.memory_space<vmem>>, vector<1x4x16xf32>
    %278 = vector.shape_cast %277 : vector<1x4x16xf32> to vector<4x16xf32>
    %c6_96 = arith.constant 6 : index
    %c0_97 = arith.constant 0 : index
    %c0_98 = arith.constant 0 : index
    %279 = vector.load %arg2[%c6_96, %c0_97, %c0_98] : memref<8x4x16xf32, #tpu.memory_space<vmem>>, vector<1x4x16xf32>
    %280 = vector.shape_cast %279 : vector<1x4x16xf32> to vector<4x16xf32>
    %281 = arith.truncf %276 : vector<4x32xf32> to vector<4x32xbf16>
    %282 = arith.truncf %274 : vector<4x32xf32> to vector<4x32xbf16>
    %cst_99 = arith.constant dense<0.000000e+00> : vector<4x16xf32>
    %283 = tpu.matmul %281, %3, %cst_99 {dimension_numbers = #tpu.dot_dimension_numbers<[1], [0], [0], [1], [0, 0, 1, 1], [], []>} : vector<4x32xbf16>, vector<32x16xbf16>, vector<4x16xf32> -> vector<4x16xf32>
    %284 = arith.addf %280, %283 : vector<4x16xf32>
    %cst_100 = arith.constant dense<0.000000e+00> : vector<4x16xf32>
    %285 = tpu.matmul %282, %4, %cst_100 {dimension_numbers = #tpu.dot_dimension_numbers<[1], [0], [0], [1], [0, 0, 1, 1], [], []>} : vector<4x32xbf16>, vector<32x16xbf16>, vector<4x16xf32> -> vector<4x16xf32>
    %286 = arith.addf %284, %285 : vector<4x16xf32>
    %287 = math.tanh %286 : vector<4x16xf32>
    %288 = arith.truncf %287 : vector<4x16xf32> to vector<4x16xbf16>
    %cst_101 = arith.constant dense<0.000000e+00> : vector<4x16xf32>
    %289 = tpu.matmul %288, %5, %cst_101 {dimension_numbers = #tpu.dot_dimension_numbers<[1], [0], [0], [1], [0, 0, 1, 1], [], []>} : vector<4x16xbf16>, vector<16x16xbf16>, vector<4x16xf32> -> vector<4x16xf32>
    %cst_102 = arith.constant dense<0xFF800000> : vector<4xf32>
    %290 = vector.multi_reduction <maximumf>, %289, %cst_102 [1] : vector<4x16xf32> to vector<4xf32>
    %291 = vector.shape_cast %290 : vector<4xf32> to vector<4x1xf32>
    %292 = vector.broadcast %291 : vector<4x1xf32> to vector<4x16xf32>
    %293 = arith.subf %289, %292 : vector<4x16xf32>
    %294 = math.exp %293 : vector<4x16xf32>
    %cst_103 = arith.constant dense<0.000000e+00> : vector<4xf32>
    %295 = vector.multi_reduction <add>, %294, %cst_103 [1] : vector<4x16xf32> to vector<4xf32>
    %296 = vector.shape_cast %295 : vector<4xf32> to vector<4x1xf32>
    %297 = tpu.reciprocal %296 {approx = true} : vector<4x1xf32> -> vector<4x1xf32>
    %298 = vector.broadcast %297 : vector<4x1xf32> to vector<4x16xf32>
    %299 = arith.mulf %294, %298 : vector<4x16xf32>
    %300 = arith.mulf %299, %278 : vector<4x16xf32>
    %301 = arith.truncf %300 : vector<4x16xf32> to vector<4x16xbf16>
    %cst_104 = arith.constant dense<0.000000e+00> : vector<4x128xf32>
    %302 = tpu.matmul %301, %6, %cst_104 {dimension_numbers = #tpu.dot_dimension_numbers<[1], [0], [0], [1], [0, 0, 1, 1], [], []>} : vector<4x16xbf16>, vector<16x128xbf16>, vector<4x128xf32> -> vector<4x128xf32>
    %cst_105 = arith.constant dense<0.000000e+00> : vector<4x128xf32>
    %303 = tpu.matmul %281, %7, %cst_105 {dimension_numbers = #tpu.dot_dimension_numbers<[1], [0], [0], [1], [0, 0, 1, 1], [], []>} : vector<4x32xbf16>, vector<32x128xbf16>, vector<4x128xf32> -> vector<4x128xf32>
    %304 = arith.addf %302, %303 : vector<4x128xf32>
    %305 = arith.addf %304, %10 : vector<4x128xf32>
    %306 = arith.negf %305 : vector<4x128xf32>
    %307 = math.exp %306 : vector<4x128xf32>
    %cst_106 = arith.constant 1.000000e+00 : f32
    %308 = vector.broadcast %cst_106 : f32 to vector<4x128xf32>
    %309 = arith.addf %308, %307 : vector<4x128xf32>
    %310 = arith.divf %308, %309 : vector<4x128xf32>
    %311 = vector.extract_strided_slice %310 {offsets = [0, 0], sizes = [4, 32], strides = [1, 1]} : vector<4x128xf32> to vector<4x32xf32>
    %312 = vector.extract_strided_slice %310 {offsets = [0, 32], sizes = [4, 32], strides = [1, 1]} : vector<4x128xf32> to vector<4x32xf32>
    %313 = vector.extract_strided_slice %310 {offsets = [0, 96], sizes = [4, 32], strides = [1, 1]} : vector<4x128xf32> to vector<4x32xf32>
    %314 = vector.extract_strided_slice %305 {offsets = [0, 64], sizes = [4, 32], strides = [1, 1]} : vector<4x128xf32> to vector<4x32xf32>
    %315 = math.tanh %314 : vector<4x32xf32>
    %316 = arith.mulf %312, %274 : vector<4x32xf32>
    %317 = arith.mulf %311, %315 : vector<4x32xf32>
    %318 = arith.addf %316, %317 : vector<4x32xf32>
    %319 = math.tanh %318 : vector<4x32xf32>
    %320 = arith.mulf %313, %319 : vector<4x32xf32>
    %c7 = arith.constant 7 : index
    %c0_107 = arith.constant 0 : index
    %c0_108 = arith.constant 0 : index
    %321 = vector.load %arg1[%c7, %c0_107, %c0_108] : memref<8x4x16xf32, #tpu.memory_space<vmem>>, vector<1x4x16xf32>
    %322 = vector.shape_cast %321 : vector<1x4x16xf32> to vector<4x16xf32>
    %c7_109 = arith.constant 7 : index
    %c0_110 = arith.constant 0 : index
    %c0_111 = arith.constant 0 : index
    %323 = vector.load %arg2[%c7_109, %c0_110, %c0_111] : memref<8x4x16xf32, #tpu.memory_space<vmem>>, vector<1x4x16xf32>
    %324 = vector.shape_cast %323 : vector<1x4x16xf32> to vector<4x16xf32>
    %325 = arith.truncf %320 : vector<4x32xf32> to vector<4x32xbf16>
    %326 = arith.truncf %318 : vector<4x32xf32> to vector<4x32xbf16>
    %cst_112 = arith.constant dense<0.000000e+00> : vector<4x16xf32>
    %327 = tpu.matmul %325, %3, %cst_112 {dimension_numbers = #tpu.dot_dimension_numbers<[1], [0], [0], [1], [0, 0, 1, 1], [], []>} : vector<4x32xbf16>, vector<32x16xbf16>, vector<4x16xf32> -> vector<4x16xf32>
    %328 = arith.addf %324, %327 : vector<4x16xf32>
    %cst_113 = arith.constant dense<0.000000e+00> : vector<4x16xf32>
    %329 = tpu.matmul %326, %4, %cst_113 {dimension_numbers = #tpu.dot_dimension_numbers<[1], [0], [0], [1], [0, 0, 1, 1], [], []>} : vector<4x32xbf16>, vector<32x16xbf16>, vector<4x16xf32> -> vector<4x16xf32>
    %330 = arith.addf %328, %329 : vector<4x16xf32>
    %331 = math.tanh %330 : vector<4x16xf32>
    %332 = arith.truncf %331 : vector<4x16xf32> to vector<4x16xbf16>
    %cst_114 = arith.constant dense<0.000000e+00> : vector<4x16xf32>
    %333 = tpu.matmul %332, %5, %cst_114 {dimension_numbers = #tpu.dot_dimension_numbers<[1], [0], [0], [1], [0, 0, 1, 1], [], []>} : vector<4x16xbf16>, vector<16x16xbf16>, vector<4x16xf32> -> vector<4x16xf32>
    %cst_115 = arith.constant dense<0xFF800000> : vector<4xf32>
    %334 = vector.multi_reduction <maximumf>, %333, %cst_115 [1] : vector<4x16xf32> to vector<4xf32>
    %335 = vector.shape_cast %334 : vector<4xf32> to vector<4x1xf32>
    %336 = vector.broadcast %335 : vector<4x1xf32> to vector<4x16xf32>
    %337 = arith.subf %333, %336 : vector<4x16xf32>
    %338 = math.exp %337 : vector<4x16xf32>
    %cst_116 = arith.constant dense<0.000000e+00> : vector<4xf32>
    %339 = vector.multi_reduction <add>, %338, %cst_116 [1] : vector<4x16xf32> to vector<4xf32>
    %340 = vector.shape_cast %339 : vector<4xf32> to vector<4x1xf32>
    %341 = tpu.reciprocal %340 {approx = true} : vector<4x1xf32> -> vector<4x1xf32>
    %342 = vector.broadcast %341 : vector<4x1xf32> to vector<4x16xf32>
    %343 = arith.mulf %338, %342 : vector<4x16xf32>
    %344 = arith.mulf %343, %322 : vector<4x16xf32>
    %345 = arith.truncf %344 : vector<4x16xf32> to vector<4x16xbf16>
    %cst_117 = arith.constant dense<0.000000e+00> : vector<4x128xf32>
    %346 = tpu.matmul %345, %6, %cst_117 {dimension_numbers = #tpu.dot_dimension_numbers<[1], [0], [0], [1], [0, 0, 1, 1], [], []>} : vector<4x16xbf16>, vector<16x128xbf16>, vector<4x128xf32> -> vector<4x128xf32>
    %cst_118 = arith.constant dense<0.000000e+00> : vector<4x128xf32>
    %347 = tpu.matmul %325, %7, %cst_118 {dimension_numbers = #tpu.dot_dimension_numbers<[1], [0], [0], [1], [0, 0, 1, 1], [], []>} : vector<4x32xbf16>, vector<32x128xbf16>, vector<4x128xf32> -> vector<4x128xf32>
    %348 = arith.addf %346, %347 : vector<4x128xf32>
    %349 = arith.addf %348, %10 : vector<4x128xf32>
    %350 = arith.negf %349 : vector<4x128xf32>
    %351 = math.exp %350 : vector<4x128xf32>
    %cst_119 = arith.constant 1.000000e+00 : f32
    %352 = vector.broadcast %cst_119 : f32 to vector<4x128xf32>
    %353 = arith.addf %352, %351 : vector<4x128xf32>
    %354 = arith.divf %352, %353 : vector<4x128xf32>
    %355 = vector.extract_strided_slice %354 {offsets = [0, 0], sizes = [4, 32], strides = [1, 1]} : vector<4x128xf32> to vector<4x32xf32>
    %356 = vector.extract_strided_slice %354 {offsets = [0, 32], sizes = [4, 32], strides = [1, 1]} : vector<4x128xf32> to vector<4x32xf32>
    %357 = vector.extract_strided_slice %354 {offsets = [0, 96], sizes = [4, 32], strides = [1, 1]} : vector<4x128xf32> to vector<4x32xf32>
    %358 = vector.extract_strided_slice %349 {offsets = [0, 64], sizes = [4, 32], strides = [1, 1]} : vector<4x128xf32> to vector<4x32xf32>
    %359 = math.tanh %358 : vector<4x32xf32>
    %360 = arith.mulf %356, %318 : vector<4x32xf32>
    %361 = arith.mulf %355, %359 : vector<4x32xf32>
    %362 = arith.addf %360, %361 : vector<4x32xf32>
    %363 = math.tanh %362 : vector<4x32xf32>
    %364 = arith.mulf %357, %363 : vector<4x32xf32>
    %c0_120 = arith.constant 0 : index
    %c0_121 = arith.constant 0 : index
    %365 = vector.load %arg13[%c0_120, %c0_121] : memref<4x32xf32, #tpu.memory_space<vmem>>, vector<4x32xf32>
    tpu.vector_store %arg13[%c0_120, %c0_121], %364 {strides = array<i32>} : memref<4x32xf32, #tpu.memory_space<vmem>>, vector<4x32xf32>,
    %c0_122 = arith.constant 0 : index
    %c0_123 = arith.constant 0 : index
    %366 = vector.load %arg14[%c0_122, %c0_123] : memref<4x32xf32, #tpu.memory_space<vmem>>, vector<4x32xf32>
    tpu.vector_store %arg14[%c0_122, %c0_123], %362 {strides = array<i32>} : memref<4x32xf32, #tpu.memory_space<vmem>>, vector<4x32xf32>,
    %367 = tpu.concatenate %56, %100, %144, %188, %232, %276, %320, %364 in 1 : vector<4x32xf32>, vector<4x32xf32>, vector<4x32xf32>, vector<4x32xf32>, vector<4x32xf32>, vector<4x32xf32>, vector<4x32xf32>, vector<4x32xf32> -> vector<4x256xf32>
    %c0_124 = arith.constant 0 : index
    %c0_125 = arith.constant 0 : index
    %c0_126 = arith.constant 0 : index
    %368 = vector.load %arg9[%c0_124, %c0_125, %c0_126] : memref<1x4x256xf32, #tpu.memory_space<vmem>>, vector<1x4x256xf32>
    %369 = vector.shape_cast %368 : vector<1x4x256xf32> to vector<4x256xf32>
    %370 = vector.shape_cast %367 : vector<4x256xf32> to vector<1x4x256xf32>
    tpu.vector_store %arg9[%c0_124, %c0_125, %c0_126], %370 {strides = array<i32>} : memref<1x4x256xf32, #tpu.memory_space<vmem>>, vector<1x4x256xf32>,
    %c0_i32_127 = arith.constant 0 : i32
    %371 = arith.cmpi eq, %arg0, %c0_i32_127 : i32
    %372 = arith.extui %371 : i1 to i32
    %c0_i32_128 = arith.constant 0 : i32
    %373 = arith.cmpi ne, %372, %c0_i32_128 : i32
    scf.if %373 {
      %c0_129 = arith.constant 0 : index
      %c0_130 = arith.constant 0 : index
      %374 = vector.load %arg10[%c0_129, %c0_130] : memref<4x32xf32, #tpu.memory_space<vmem>>, vector<4x32xf32>
      tpu.vector_store %arg10[%c0_129, %c0_130], %364 {strides = array<i32>} : memref<4x32xf32, #tpu.memory_space<vmem>>, vector<4x32xf32>,
      %c0_131 = arith.constant 0 : index
      %c0_132 = arith.constant 0 : index
      %375 = vector.load %arg11[%c0_131, %c0_132] : memref<4x32xf32, #tpu.memory_space<vmem>>, vector<4x32xf32>
      tpu.vector_store %arg11[%c0_131, %c0_132], %362 {strides = array<i32>} : memref<4x32xf32, #tpu.memory_space<vmem>>, vector<4x32xf32>,
      %c0_133 = arith.constant 0 : index
      %c0_134 = arith.constant 0 : index
      %376 = vector.load %arg12[%c0_133, %c0_134] : memref<4x16xf32, #tpu.memory_space<vmem>>, vector<4x16xf32>
      tpu.vector_store %arg12[%c0_133, %c0_134], %343 {strides = array<i32>} : memref<4x16xf32, #tpu.memory_space<vmem>>, vector<4x16xf32>,
    } else {
    }
    return
  }
  func.func @transform_0(%arg0: i32) -> (i32, i32, i32) {
    %c0_i32 = arith.constant 0 : i32
    %c0_i32_0 = arith.constant 0 : i32
    %c0_i32_1 = arith.constant 0 : i32
    return %arg0, %c0_i32, %c0_i32_0 : i32, i32, i32
  }
  func.func @transform_1(%arg0: i32) -> (i32, i32, i32) {
    %c0_i32 = arith.constant 0 : i32
    %c0_i32_0 = arith.constant 0 : i32
    %c0_i32_1 = arith.constant 0 : i32
    return %arg0, %c0_i32, %c0_i32_0 : i32, i32, i32
  }
  func.func @transform_2(%arg0: i32) -> (i32, i32) {
    %c0_i32 = arith.constant 0 : i32
    %c0_i32_0 = arith.constant 0 : i32
    %c0_i32_1 = arith.constant 0 : i32
    return %c0_i32, %c0_i32_0 : i32, i32
  }
  func.func @transform_3(%arg0: i32) -> (i32, i32) {
    %c0_i32 = arith.constant 0 : i32
    %c0_i32_0 = arith.constant 0 : i32
    %c0_i32_1 = arith.constant 0 : i32
    return %c0_i32, %c0_i32_0 : i32, i32
  }
  func.func @transform_4(%arg0: i32) -> (i32, i32) {
    %c0_i32 = arith.constant 0 : i32
    %c0_i32_0 = arith.constant 0 : i32
    %c0_i32_1 = arith.constant 0 : i32
    return %c0_i32, %c0_i32_0 : i32, i32
  }
  func.func @transform_5(%arg0: i32) -> (i32, i32) {
    %c0_i32 = arith.constant 0 : i32
    %c0_i32_0 = arith.constant 0 : i32
    %c0_i32_1 = arith.constant 0 : i32
    return %c0_i32, %c0_i32_0 : i32, i32
  }
  func.func @transform_6(%arg0: i32) -> (i32, i32) {
    %c0_i32 = arith.constant 0 : i32
    %c0_i32_0 = arith.constant 0 : i32
    %c0_i32_1 = arith.constant 0 : i32
    return %c0_i32, %c0_i32_0 : i32, i32
  }
  func.func @transform_7(%arg0: i32) -> (i32, i32) {
    %c0_i32 = arith.constant 0 : i32
    %c0_i32_0 = arith.constant 0 : i32
    %c0_i32_1 = arith.constant 0 : i32
    return %c0_i32, %c0_i32_0 : i32, i32
  }
  func.func @transform_8(%arg0: i32) -> (i32, i32, i32) {
    %c0_i32 = arith.constant 0 : i32
    %c0_i32_0 = arith.constant 0 : i32
    %c0_i32_1 = arith.constant 0 : i32
    return %arg0, %c0_i32, %c0_i32_0 : i32, i32, i32
  }
  func.func @transform_9(%arg0: i32) -> (i32, i32) {
    %c0_i32 = arith.constant 0 : i32
    %c0_i32_0 = arith.constant 0 : i32
    %c0_i32_1 = arith.constant 0 : i32
    return %c0_i32, %c0_i32_0 : i32, i32
  }
  func.func @transform_10(%arg0: i32) -> (i32, i32) {
    %c0_i32 = arith.constant 0 : i32
    %c0_i32_0 = arith.constant 0 : i32
    %c0_i32_1 = arith.constant 0 : i32
    return %c0_i32, %c0_i32_0 : i32, i32
  }
  func.func @transform_11(%arg0: i32) -> (i32, i32) {
    %c0_i32 = arith.constant 0 : i32
    %c0_i32_0 = arith.constant 0 : i32
    %c0_i32_1 = arith.constant 0 : i32
    return %c0_i32, %c0_i32_0 : i32, i32
  }
}

</mosaic_0001>

<bundles_post_ra>
// kernel: tpu_custom_call.1
= control target key start
LH: loop header
LB: loop body
LE: loop exit
PB: predicated region body
PF: predicated region fallthrough
CT: control target
= control target key end

     0   :  { %17 = vsyncpa [#allocation5], 0  ;;  %s3724_s0 = inlined_call_operand.vmem [shape: f32[8,4,16], index: 0, kind: input, shape index: {}]   ;;  %s3725_s1 = inlined_call_operand.hbm [shape: f32[8,4,16], index: 1, kind: input, shape index: {}]   ;;  %s3726_s2 = inlined_call_operand.vmem [shape: bf16[32,16], index: 2, kind: input, shape index: {}]   ;;  %s3727_s3 = inlined_call_operand.vmem [shape: bf16[32,16], index: 3, kind: input, shape index: {}]   ;;  %s3728_s4 = inlined_call_operand.hbm [shape: bf16[16,16], index: 4, kind: input, shape index: {}]   ;;  %s3729_s5 = inlined_call_operand.vmem [shape: bf16[16,128], index: 5, kind: input, shape index: {}]   ;;  %s3730_s6 = inlined_call_operand.vmem [shape: bf16[32,128], index: 6, kind: input, shape index: {}]   ;;  %s3731_s7 = inlined_call_operand.vmem [shape: f32[1,128], index: 7, kind: input, shape index: {}]   ;;  %s3732_s8 = inlined_call_operand.hbm [shape: f32[1,4,256], index: 8, kind: output, shape index: {0}]   ;;  %s3733_s9 = inlined_call_operand.hbm [shape: f32[4,32], index: 9, kind: output, shape index: {1}]   ;;  %s3734_s10 = inlined_call_operand.hbm [shape: f32[4,32], index: 10, kind: output, shape index: {2}]   ;;  %s3735_s11 = inlined_call_operand.hbm [shape: f32[4,16], index: 11, kind: output, shape index: {3}]  }
   0x1   :  { %18 = vsyncpa [#allocation8], 0 }
   0x2   :  { %19 = vsyncpa [#allocation6], 0 }
   0x3   :  { %20 = vsyncpa [#allocation11], 0 }
   0x4   :  { %21 = vsyncpa [#allocation14], 0  ;;  %s3110_s17 = smov [#allocation4]  }
   0x5   :  { %s29_s18 = sshll.u32 %s3110_s17, 4  ;;  %s30_s18 = int_to_ptr.vmem [resolvable:$true] %s29_s18 }
   0x6   :  { %s2988_s19 = scalar_lea.vmem %s30_s18, 512  ;;  %p2993_p1 = scmp.lt.s32.totalorder %s30_s18, %s30_s18 }
   0x7   :  { %p2989_p0 = scmp.ne.s32.totalorder %s30_s18, %s2988_s19  ;;  %p2994_p2 = scmp.lt.s32.totalorder %s2988_s19, %s2988_s19 }
   0x9   :  { %p2995_p3 = por %p2994_p2, %p2993_p1 }
   0xb   :  { %p2996_p4 = pnand %p2995_p3, %p2989_p0 }
   0xd   :  { %2999 = shalt.err (!%p2996_p4)
}
   0xe   :  { %s3111_s20 = smov 64   ;;  %s3112_s21 = smov 4  }
   0xf   :  { %35 = dma.hbm_to_vmem [thread:$0]  %s3725_s1, 512, %s30_s18, [#allocation5], %s3111_s20, %s3111_s20, %s3112_s21  }
  0x10   :  { %s3113_s24 = smov [#allocation7]  }
  0x11   :  { %s45_s25 = sshll.u32 %s3113_s24, 4  ;;  %s46_s25 = int_to_ptr.vmem [resolvable:$true] %s45_s25 }
  0x12   :  { %s3008_s26 = scalar_lea.vmem %s46_s25, 128  ;;  %p3013_p6 = scmp.lt.s32.totalorder %s46_s25, %s46_s25 }
  0x13   :  { %p3009_p5 = scmp.ne.s32.totalorder %s46_s25, %s3008_s26  ;;  %p3014_p7 = scmp.lt.s32.totalorder %s3008_s26, %s3008_s26 }
  0x15   :  { %p3015_p8 = por %p3014_p7, %p3013_p6 }
  0x17   :  { %p3016_p9 = pnand %p3015_p8, %p3009_p5 }
  0x19   :  { %3019 = shalt.err (!%p3016_p9)
}
  0x1a   :  { %51 = dma.hbm_to_vmem [thread:$0]  %s3728_s4, 128, %s46_s25, [#allocation8], %s3111_s20, %s3111_s20, %s3112_s21  }
  0x1b   :  { %3100 = dma.done.wait [#allocation5], 512  }
  0x1c   :  { %3101 = vsyncadd [#allocation5], 4294966784 }
  0x1d   :  { %3102 = dma.done.wait [#allocation8], 128  }
  0x1e   :  { %3103 = vsyncadd [#allocation8], 4294967168  ;;  %vm69_vm0 = vcmask 257024   ;;  %v3114_v0 = vmov 0.0   ;;  %vm3115_vm1 = vmmov 0   ;;  %v3205_v1 = vld [vmem:[%s3726_s2 + $0x8] sm:$0xff]  }
  0x1f   :  { %2551 = vmatprep.subr.bf16.mxu0 %v3114_v0  ;;  %2559 = vmatprep.subr.bf16.mxu1 %v3114_v0  ;;  %70 = vst.msk [vmem:[#allocation2] sm:$0xf] %vm69_vm0, %v3114_v0  ;;  %71 = vst.msk [vmem:[#allocation3] sm:$0xf] %vm69_vm0, %v3114_v0  ;;  %v3210_v2 = vld [vmem:[%s3727_s3 + $0x8] sm:$0xff]   ;;  %v3216_v3 = vld [vmem:[%s3726_s2] sm:$0xff]  }
  0x20   :  { %2555 = vmatprep.mubr.msk.bf16.mxu0 %vm3115_vm1, %v3114_v0  ;;  %2563 = vmatprep.mubr.msk.bf16.mxu1 %vm3115_vm1, %v3114_v0  ;;  %v3223_v4 = vld [vmem:[%s3727_s3] sm:$0xff]   ;;  %vm113_vm2 = vcmask 261120   ;;  %v3240_v9 = vld [vmem:[#allocation7] sm:$0xff]   ;;  %vm222_vm3 = vcmask 130048   ;;  %vm266_vm4 = vcmask 125952   ;;  %s3116_s27 = smov 32  }
  0x21   :  { %2552 = vmatpush3.bf16.msra.mxu0 %v3205_v1  ;;  %2560 = vmatpush3.bf16.msra.mxu1 %v3210_v2  ;;  %v98_v10 = vld [vmem:[#allocation4] sm:$0xf]  ;;  %v3257_v34 = vld [vmem:[%s3729_s5] sm:$0xff]   ;;  %s3117_s28 = smov 96  }
  0x22   :  { %2553 = vmatprep.subr.bf16.mxu0 %v3114_v0  ;;  %2561 = vmatprep.subr.bf16.mxu1 %v3114_v0  ;;  %v3252_v33 = vld [vmem:[%s3730_s6 + $0x8] sm:$0xff]   ;;  %v3263_v35 = vld [vmem:[%s3730_s6] sm:$0xff]  }
  0x23   :  { %v97_v38 = vld [vmem:[%s3724_s0] sm:$0xf] }
  0x24   :  { %v3290_v46 = vld [vmem:[%s3731_s7] ss:$0 sm:$0xff] }
  0x25   :  { %2554 = vmatpush3.bf16.msra.mxu0 %v3216_v3  ;;  %2562 = vmatpush3.bf16.msra.mxu1 %v3223_v4 }
  0x26   :  { %v95_v5 = vld [vmem:[#allocation2] sm:$0xf]  ;;  %v3226_v6 = vld [vmem:[#allocation3] sm:$0xf]  ;;  %2567 = vmatprep.subr.bf16.mxu0 %v3114_v0  ;;  %2573 = vmatprep.subr.bf16.mxu1 %v3114_v0 }
  0x27   :  { %v99_v7 = vpack.c.bf16 %v95_v5, %v95_v5  ;;  %v100_v8 = vpack.c.bf16 %v3226_v6, %v3226_v6 }
  0x29   :  { %2556 = vmatmul.mubr.msk.bf16.vlgmr.msra.gmra.mxu0 %vm113_vm2, %v99_v7  ;;  %2564 = vmatmul.mubr.msk.bf16.vlgmr.msra.gmra.mxu1 %vm113_vm2, %v100_v8 }
  0x2a   :  { %2569 = vmatprep.mubr.msk.bf16.mxu0 %vm3115_vm1, %v3114_v0  ;;  %2577 = vmatprep.mubr.msk.bf16.mxu1 %vm3115_vm1, %v3114_v0 }
  0x2b   :  { %2568 = vmatpush3.bf16.msra.mxu0 %v3240_v9  ;;  %2574 = vmatpush3.bf16.msra.mxu1 %v3252_v33 }
  0x2c   :  { %2581 = vmatprep.subr.bf16.mxu0 %v3114_v0  ;;  %2575 = vmatprep.subr.bf16.mxu1 %v3114_v0 }
  0x2f   :  { %2576 = vmatpush3.bf16.msra.mxu1 %v3263_v35 }
  0x30   :  { %2587 = vmatprep.subr.bf16.mxu1 %v3114_v0 }
  0x32   :  { %2578 = vmatmul.mubr.msk.bf16.vlgmr.msra.gmra.mxu1 %vm113_vm2, %v99_v7 }
  0x33   :  { %2588 = vmatpush3.bf16.msra.mxu1 %v3205_v1  ;;  %2591 = vmatprep.mubr.msk.bf16.mxu1 %vm3115_vm1, %v3114_v0 }
  0x34   :  { %2589 = vmatprep.subr.bf16.mxu1 %v3114_v0 }
  0x37   :  { %2590 = vmatpush3.bf16.msra.mxu1 %v3216_v3 }
  0x38   :  { %2603 = vmatprep.subr.bf16.mxu1 %v3114_v0 }
  0xe9   :  { %v151_v11 = vpop.f32.mrf.mxu0  ;;  %v207_v13 = vpop.f32.mrf.mxu1 }
  0xea   :  { %v157_v12 = vadd.f32 %v151_v11, %v98_v10 }
  0xeb   :  { %v2557_v14 = vpop.f32.mrf.mxu0  ;;  %v2565_v16 = vpop.f32.mrf.mxu1 }
  0xec   :  { %v213_v15 = vadd.f32 %v207_v13, %v157_v12  ;;  %v413_v13 = vld [vmem:[#allocation4 + $0x4] sm:$0xf] }
  0xed   :  { %v154_v17 = vpop.f32.mrf.mxu0  ;;  %v210_v18 = vpop.f32.mrf.mxu1 }
  0xee   :  { %2859 = vtanh.f32 %v213_v15 }
  0xef   :  { %v2558_v19 = vpop.f32.mrf.mxu0  ;;  %v2566_v20 = vpop.f32.mrf.mxu1 }
  0xf2   :  { %v326_v42 = vpop.f32.mrf.mxu1 }
  0xf4   :  { %v2579_v43 = vpop.f32.mrf.mxu1 }
  0xf6   :  { %v329_v44 = vpop.f32.mrf.mxu1 }
  0xf8   :  { %v2580_v45 = vpop.f32.mrf.mxu1 }
  0xf9   :  { %v2398_v45 = vld [vmem:[%s3724_s0 + $0x4] sm:$0xf] }
  0xfb   :  { %v2860_v21 = vpop.eup %2859 }
  0xfc   :  { %v215_v22 = vpack.c.bf16 %v2860_v21, %v2860_v21 }
  0xfe   :  { %2570 = vmatmul.mubr.msk.bf16.vlgmr.msra.gmra.mxu0 %vm222_vm3, %v215_v22 }
  0xff   :  { %2583 = vmatprep.mubr.msk.bf16.mxu0 %vm3115_vm1, %v3114_v0  ;;  %2582 = vmatpush3.bf16.msra.mxu0 %v3257_v34 }
 0x100   :  { %2595 = vmatprep.subr.bf16.mxu0 %v3114_v0 }
 0x1be   :  { %v260_v23 = vpop.f32.mrf.mxu0 }
 0x1bf   :  { %v267_v24 = vsel %vm266_vm4, %v260_v23, -inf }
 0x1c0   :  { %268 = vmax.xlane.f32.xlu0 %v267_v24  ;;  %v2571_v25 = vpop.f32.mrf.mxu0 }
 0x1c2   :  { %v263_v26 = vpop.f32.mrf.mxu0 }
 0x1c4   :  { %v2572_v27 = vpop.f32.mrf.mxu0 }
 0x249   :  { %v269_v28 = vpop.xlane.xlu0 %268 }
 0x24a   :  { %v270_v29 = vsub.f32 %v260_v23, %v269_v28 }
 0x24c   :  { %v271_v30 = vmul.f32 1.442695, %v270_v29 }
 0x24e   :  { %2861 = vpow2.f32 %v271_v30 }
 0x25b   :  { %v2862_v31 = vpop.eup %2861 }
 0x25c   :  { %v273_v32 = vsel %vm266_vm4, %v2862_v31, 0.0 }
 0x25d   :  { %274 = vadd.xlane.f32.xlu0 %v273_v32 }
 0x2e6   :  { %v275_v36 = vpop.xlane.xlu0 %274 }
 0x2e7   :  { %2863 = vrcp.f32 %v275_v36 }
 0x2f4   :  { %v2864_v37 = vpop.eup %2863 }
 0x2f5   :  { %v277_v39 = vmul.f32 %v2864_v37, %v2862_v31 }
 0x2f7   :  { %v278_v40 = vmul.f32 %v277_v39, %v97_v38 }
 0x2f9   :  { %v279_v41 = vpack.c.bf16 %v278_v40, %v278_v40 }
 0x2fb   :  { %2584 = vmatmul.mubr.msk.bf16.vlgmr.msra.gmra.mxu0 %vm222_vm3, %v279_v41 }
 0x2fc   :  { %2596 = vmatpush3.bf16.msra.mxu0 %v3210_v2  ;;  %2599 = vmatprep.mubr.msk.bf16.mxu0 %vm3115_vm1, %v3114_v0 }
 0x2fd   :  { %2597 = vmatprep.subr.bf16.mxu0 %v3114_v0 }
 0x300   :  { %2598 = vmatpush3.bf16.msra.mxu0 %v3223_v4 }
 0x301   :  { %2609 = vmatprep.subr.bf16.mxu0 %v3114_v0 }
 0x3bb   :  { %v375_v47 = vpop.f32.mrf.mxu0 }
 0x3bc   :  { %v376_v48 = vadd.f32 %v375_v47, %v326_v42 }
 0x3bd   :  { %v2585_v49 = vpop.f32.mrf.mxu0 }
 0x3be   :  { %v381_v50 = vadd.f32 %v3290_v46, %v376_v48 }
 0x3bf   :  { %v378_v51 = vpop.f32.mrf.mxu0 }
 0x3c0   :  { %2865 = vtanh.f32 %v381_v50  ;;  %v2397_v54 = vmul.f32 -1.442695, %v381_v50 }
 0x3c1   :  { %v2586_v52 = vpop.f32.mrf.mxu0 }
 0x3c2   :  { %2867 = vpow2.f32 %v2397_v54 }
 0x3cd   :  { %v2866_v53 = vpop.eup %2865 }
 0x3ce   :  { %395 = vrot.lane.b32.xlu1 %v2866_v53, %s3111_s20 }
 0x3cf   :  { %v2868_v55 = vpop.eup %2867 }
 0x3d0   :  { %v385_v56 = vadd.f32 1.0, %v2868_v55 }
 0x3d2   :  { %390 = vrot.lane.b32.xlu1 %v3226_v6, %s3116_s27  ;;  %2869 = vrcp.f32 %v385_v56 }
 0x3df   :  { %v2870_v57 = vpop.eup %2869 }
 0x440   :  { %v396_v58 = vpop.permute.xlu1 %395 }
 0x441   :  { %v398_v59 = vmul.f32 %v2870_v57, %v396_v58 }
 0x443   :  { %400 = vrot.lane.b32.xlu0 %v398_v59, %s3116_s27 }
 0x444   :  { %v391_v60 = vpop.permute.xlu1 %390 }
 0x445   :  { %v393_v61 = vmul.f32 %v2870_v57, %v391_v60 }
 0x4b5   :  { %v401_v62 = vpop.permute.xlu0 %400 }
 0x4b6   :  { %v3297_v63 = vadd.f32 %v401_v62, %v393_v61 }
 0x4b8   :  { %2871 = vtanh.f32 %v3297_v63  ;;  %v415_v10 = vpack.c.bf16 %v3297_v63, %v3297_v63 }
 0x4c5   :  { %v2872_v5 = vpop.eup %2871 }
 0x4c6   :  { %406 = vrot.lane.b32.xlu1 %v2872_v5, %s3111_s20 }
 0x538   :  { %v407_v6 = vpop.permute.xlu1 %406 }
 0x539   :  { %v3301_v7 = vmul.f32 %v2870_v57, %v407_v6 }
 0x53b   :  { %v414_v8 = vpack.c.bf16 %v3301_v7, %v3301_v7 }
 0x53d   :  { %417 = vrot.lane.b32.xlu1 %v414_v8, %s3116_s27 }
 0x541   :  { %464 = vrot.lane.b32.xlu1 %v415_v10, %s3117_s28 }
 0x5af   :  { %v418_v11 = vpop.permute.xlu1 %417 }
 0x5b0   :  { %2592 = vmatmul.mubr.msk.bf16.vlgmr.msra.gmra.mxu1 %vm113_vm2, %v418_v11 }
 0x5b1   :  { %2604 = vmatpush3.bf16.msra.mxu1 %v3240_v9  ;;  %2605 = vmatprep.mubr.msk.bf16.mxu1 %vm3115_vm1, %v3114_v0 }
 0x5b2   :  { %2617 = vmatprep.subr.bf16.mxu1 %v3114_v0 }
 0x5b3   :  { %v465_v12 = vpop.permute.xlu1 %464 }
 0x5b4   :  { %2600 = vmatmul.mubr.msk.bf16.vlgmr.msra.gmra.mxu0 %vm113_vm2, %v465_v12 }
 0x5b5   :  { %2610 = vmatpush3.bf16.msra.mxu0 %v3252_v33  ;;  %2613 = vmatprep.mubr.msk.bf16.mxu0 %vm3115_vm1, %v3114_v0 }
 0x5b6   :  { %2611 = vmatprep.subr.bf16.mxu0 %v3114_v0 }
 0x5b9   :  { %2612 = vmatpush3.bf16.msra.mxu0 %v3263_v35 }
 0x5ba   :  { %2623 = vmatprep.subr.bf16.mxu0 %v3114_v0 }
 0x5bc   :  { %2614 = vmatmul.mubr.msk.bf16.vlgmr.msra.gmra.mxu0 %vm113_vm2, %v418_v11 }
 0x5bd   :  { %2624 = vmatpush3.bf16.msra.mxu0 %v3205_v1  ;;  %2627 = vmatprep.mubr.msk.bf16.mxu0 %vm3115_vm1, %v3114_v0 }
 0x5be   :  { %2625 = vmatprep.subr.bf16.mxu0 %v3114_v0 }
 0x5c1   :  { %2626 = vmatpush3.bf16.msra.mxu0 %v3216_v3 }
 0x5c2   :  { %2639 = vmatprep.subr.bf16.mxu0 %v3114_v0 }
 0x670   :  { %v456_v14 = vpop.f32.mrf.mxu1 }
 0x671   :  { %v462_v16 = vadd.f32 %v456_v14, %v413_v13 }
 0x672   :  { %v2593_v15 = vpop.f32.mrf.mxu1 }
 0x674   :  { %v459_v17 = vpop.f32.mrf.mxu1  ;;  %v503_v18 = vpop.f32.mrf.mxu0 }
 0x675   :  { %v509_v19 = vadd.f32 %v503_v18, %v462_v16  ;;  %v679_v16 = vld [vmem:[#allocation4 + $0x8] sm:$0xf] }
 0x676   :  { %v2594_v20 = vpop.f32.mrf.mxu1  ;;  %v2601_v21 = vpop.f32.mrf.mxu0 }
 0x677   :  { %2873 = vtanh.f32 %v509_v19 }
 0x678   :  { %v506_v22 = vpop.f32.mrf.mxu0 }
 0x67a   :  { %v2602_v23 = vpop.f32.mrf.mxu0 }
 0x67c   :  { %v602_v24 = vpop.f32.mrf.mxu0 }
 0x67e   :  { %v2615_v25 = vpop.f32.mrf.mxu0 }
 0x680   :  { %v605_v26 = vpop.f32.mrf.mxu0 }
 0x682   :  { %v2616_v27 = vpop.f32.mrf.mxu0 }
 0x684   :  { %v2874_v28 = vpop.eup %2873 }
 0x685   :  { %v511_v29 = vpack.c.bf16 %v2874_v28, %v2874_v28 }
 0x687   :  { %2606 = vmatmul.mubr.msk.bf16.vlgmr.msra.gmra.mxu1 %vm222_vm3, %v511_v29 }
 0x688   :  { %2618 = vmatpush3.bf16.msra.mxu1 %v3257_v34  ;;  %2619 = vmatprep.mubr.msk.bf16.mxu1 %vm3115_vm1, %v3114_v0 }
 0x689   :  { %2631 = vmatprep.subr.bf16.mxu1 %v3114_v0 }
 0x747   :  { %v549_v30 = vpop.f32.mrf.mxu1 }
 0x748   :  { %v555_v31 = vsel %vm266_vm4, %v549_v30, -inf }
 0x749   :  { %556 = vmax.xlane.f32.xlu1 %v555_v31  ;;  %v2607_v32 = vpop.f32.mrf.mxu1 }
 0x74b   :  { %v552_v36 = vpop.f32.mrf.mxu1 }
 0x74d   :  { %v2608_v37 = vpop.f32.mrf.mxu1 }
 0x7d2   :  { %v557_v38 = vpop.xlane.xlu1 %556 }
 0x7d3   :  { %v558_v39 = vsub.f32 %v549_v30, %v557_v38 }
 0x7d5   :  { %v559_v40 = vmul.f32 1.442695, %v558_v39 }
 0x7d7   :  { %2875 = vpow2.f32 %v559_v40 }
 0x7e4   :  { %v2876_v41 = vpop.eup %2875 }
 0x7e5   :  { %v561_v42 = vsel %vm266_vm4, %v2876_v41, 0.0 }
 0x7e6   :  { %562 = vadd.xlane.f32.xlu0 %v561_v42 }
 0x86f   :  { %v563_v43 = vpop.xlane.xlu0 %562 }
 0x870   :  { %2877 = vrcp.f32 %v563_v43 }
 0x87d   :  { %v2878_v44 = vpop.eup %2877 }
 0x87e   :  { %v565_v47 = vmul.f32 %v2878_v44, %v2876_v41 }
 0x880   :  { %v566_v48 = vmul.f32 %v2398_v45, %v565_v47 }
 0x882   :  { %v567_v49 = vpack.c.bf16 %v566_v48, %v566_v48 }
 0x884   :  { %2620 = vmatmul.mubr.msk.bf16.vlgmr.msra.gmra.mxu1 %vm222_vm3, %v567_v49  ;;  %v2405_v49 = vld [vmem:[%s3724_s0 + $0x8] sm:$0xf] }
 0x885   :  { %2632 = vmatpush3.bf16.msra.mxu1 %v3210_v2  ;;  %2635 = vmatprep.mubr.msk.bf16.mxu1 %vm3115_vm1, %v3114_v0 }
 0x886   :  { %2633 = vmatprep.subr.bf16.mxu1 %v3114_v0 }
 0x889   :  { %2634 = vmatpush3.bf16.msra.mxu1 %v3223_v4 }
 0x88a   :  { %2645 = vmatprep.subr.bf16.mxu1 %v3114_v0 }
 0x944   :  { %v645_v50 = vpop.f32.mrf.mxu1 }
 0x945   :  { %v646_v51 = vadd.f32 %v645_v50, %v602_v24 }
 0x946   :  { %v2621_v52 = vpop.f32.mrf.mxu1 }
 0x947   :  { %v651_v53 = vadd.f32 %v3290_v46, %v646_v51 }
 0x948   :  { %v648_v54 = vpop.f32.mrf.mxu1 }
 0x949   :  { %2879 = vtanh.f32 %v651_v53  ;;  %v2404_v57 = vmul.f32 -1.442695, %v651_v53 }
 0x94a   :  { %v2622_v55 = vpop.f32.mrf.mxu1 }
 0x94b   :  { %2881 = vpow2.f32 %v2404_v57 }
 0x956   :  { %v2880_v56 = vpop.eup %2879 }
 0x957   :  { %661 = vrot.lane.b32.xlu1 %v2880_v56, %s3111_s20 }
 0x958   :  { %v2882_v58 = vpop.eup %2881 }
 0x959   :  { %v655_v59 = vadd.f32 1.0, %v2882_v58 }
 0x95b   :  { %2883 = vrcp.f32 %v655_v59 }
 0x968   :  { %v2884_v60 = vpop.eup %2883 }
 0x969   :  { %v659_v5 = vmul.f32 %v2884_v60, %v3297_v63 }
 0x9c9   :  { %v662_v61 = vpop.permute.xlu1 %661 }
 0x9ca   :  { %v664_v62 = vmul.f32 %v2884_v60, %v662_v61 }
 0x9cc   :  { %666 = vrot.lane.b32.xlu0 %v664_v62, %s3116_s27 }
 0xa3e   :  { %v667_v6 = vpop.permute.xlu0 %666 }
 0xa3f   :  { %v3349_v8 = vadd.f32 %v667_v6, %v659_v5 }
 0xa41   :  { %2885 = vtanh.f32 %v3349_v8  ;;  %v681_v14 = vpack.c.bf16 %v3349_v8, %v3349_v8 }
 0xa4e   :  { %v2886_v10 = vpop.eup %2885 }
 0xa4f   :  { %672 = vrot.lane.b32.xlu1 %v2886_v10, %s3111_s20 }
 0xac1   :  { %v673_v11 = vpop.permute.xlu1 %672 }
 0xac2   :  { %v3353_v12 = vmul.f32 %v2884_v60, %v673_v11 }
 0xac4   :  { %v680_v13 = vpack.c.bf16 %v3353_v12, %v3353_v12 }
 0xac6   :  { %683 = vrot.lane.b32.xlu1 %v680_v13, %s3116_s27 }
 0xaca   :  { %730 = vrot.lane.b32.xlu1 %v681_v14, %s3117_s28 }
 0xb38   :  { %v684_v63 = vpop.permute.xlu1 %683 }
 0xb39   :  { %2628 = vmatmul.mubr.msk.bf16.vlgmr.msra.gmra.mxu0 %vm113_vm2, %v684_v63 }
 0xb3a   :  { %2640 = vmatpush3.bf16.msra.mxu0 %v3240_v9  ;;  %2641 = vmatprep.mubr.msk.bf16.mxu0 %vm3115_vm1, %v3114_v0 }
 0xb3b   :  { %2653 = vmatprep.subr.bf16.mxu0 %v3114_v0 }
 0xb3c   :  { %v731_v15 = vpop.permute.xlu1 %730 }
 0xb3d   :  { %2636 = vmatmul.mubr.msk.bf16.vlgmr.msra.gmra.mxu1 %vm113_vm2, %v731_v15 }
 0xb3e   :  { %2646 = vmatpush3.bf16.msra.mxu1 %v3252_v33  ;;  %2649 = vmatprep.mubr.msk.bf16.mxu1 %vm3115_vm1, %v3114_v0 }
 0xb3f   :  { %2647 = vmatprep.subr.bf16.mxu1 %v3114_v0 }
 0xb42   :  { %2648 = vmatpush3.bf16.msra.mxu1 %v3263_v35 }
 0xb43   :  { %2659 = vmatprep.subr.bf16.mxu1 %v3114_v0 }
 0xb45   :  { %2650 = vmatmul.mubr.msk.bf16.vlgmr.msra.gmra.mxu1 %vm113_vm2, %v684_v63 }
 0xb46   :  { %2660 = vmatpush3.bf16.msra.mxu1 %v3205_v1  ;;  %2663 = vmatprep.mubr.msk.bf16.mxu1 %vm3115_vm1, %v3114_v0 }
 0xb47   :  { %2661 = vmatprep.subr.bf16.mxu1 %v3114_v0 }
 0xb4a   :  { %2662 = vmatpush3.bf16.msra.mxu1 %v3216_v3 }
 0xb4b   :  { %2675 = vmatprep.subr.bf16.mxu1 %v3114_v0 }
 0xbf9   :  { %v722_v17 = vpop.f32.mrf.mxu0 }
 0xbfa   :  { %v728_v19 = vadd.f32 %v722_v17, %v679_v16 }
 0xbfb   :  { %v2629_v18 = vpop.f32.mrf.mxu0 }
 0xbfd   :  { %v725_v20 = vpop.f32.mrf.mxu0  ;;  %v769_v21 = vpop.f32.mrf.mxu1 }
 0xbfe   :  { %v775_v22 = vadd.f32 %v769_v21, %v728_v19 }
 0xbff   :  { %v2630_v23 = vpop.f32.mrf.mxu0  ;;  %v2637_v24 = vpop.f32.mrf.mxu1 }
 0xc00   :  { %2887 = vtanh.f32 %v775_v22  ;;  %v945_v24 = vld [vmem:[#allocation4 + $0xc] sm:$0xf] }
 0xc01   :  { %v772_v25 = vpop.f32.mrf.mxu1 }
 0xc03   :  { %v2638_v26 = vpop.f32.mrf.mxu1 }
 0xc05   :  { %v868_v27 = vpop.f32.mrf.mxu1 }
 0xc07   :  { %v2651_v28 = vpop.f32.mrf.mxu1 }
 0xc09   :  { %v871_v29 = vpop.f32.mrf.mxu1 }
 0xc0b   :  { %v2652_v30 = vpop.f32.mrf.mxu1 }
 0xc0d   :  { %v2888_v31 = vpop.eup %2887 }
 0xc0e   :  { %v777_v32 = vpack.c.bf16 %v2888_v31, %v2888_v31 }
 0xc10   :  { %2642 = vmatmul.mubr.msk.bf16.vlgmr.msra.gmra.mxu0 %vm222_vm3, %v777_v32 }
 0xc11   :  { %2654 = vmatpush3.bf16.msra.mxu0 %v3257_v34  ;;  %2655 = vmatprep.mubr.msk.bf16.mxu0 %vm3115_vm1, %v3114_v0 }
 0xc12   :  { %2667 = vmatprep.subr.bf16.mxu0 %v3114_v0 }
 0xcd0   :  { %v815_v36 = vpop.f32.mrf.mxu0 }
 0xcd1   :  { %v821_v37 = vsel %vm266_vm4, %v815_v36, -inf }
 0xcd2   :  { %822 = vmax.xlane.f32.xlu0 %v821_v37  ;;  %v2643_v38 = vpop.f32.mrf.mxu0 }
 0xcd4   :  { %v818_v39 = vpop.f32.mrf.mxu0 }
 0xcd6   :  { %v2644_v40 = vpop.f32.mrf.mxu0 }
 0xd5b   :  { %v823_v41 = vpop.xlane.xlu0 %822 }
 0xd5c   :  { %v824_v42 = vsub.f32 %v815_v36, %v823_v41 }
 0xd5e   :  { %v825_v43 = vmul.f32 1.442695, %v824_v42 }
 0xd60   :  { %2889 = vpow2.f32 %v825_v43 }
 0xd6d   :  { %v2890_v44 = vpop.eup %2889 }
 0xd6e   :  { %v827_v45 = vsel %vm266_vm4, %v2890_v44, 0.0 }
 0xd6f   :  { %828 = vadd.xlane.f32.xlu1 %v827_v45 }
 0xdf8   :  { %v829_v47 = vpop.xlane.xlu1 %828 }
 0xdf9   :  { %2891 = vrcp.f32 %v829_v47 }
 0xe06   :  { %v2892_v48 = vpop.eup %2891 }
 0xe07   :  { %v831_v50 = vmul.f32 %v2892_v48, %v2890_v44 }
 0xe09   :  { %v832_v51 = vmul.f32 %v2405_v49, %v831_v50 }
 0xe0b   :  { %v833_v52 = vpack.c.bf16 %v832_v51, %v832_v51 }
 0xe0d   :  { %2656 = vmatmul.mubr.msk.bf16.vlgmr.msra.gmra.mxu0 %vm222_vm3, %v833_v52 }
 0xe0e   :  { %2668 = vmatpush3.bf16.msra.mxu0 %v3210_v2  ;;  %2671 = vmatprep.mubr.msk.bf16.mxu0 %vm3115_vm1, %v3114_v0 }
 0xe0f   :  { %2669 = vmatprep.subr.bf16.mxu0 %v3114_v0 }
 0xe12   :  { %2670 = vmatpush3.bf16.msra.mxu0 %v3223_v4 }
 0xe13   :  { %2681 = vmatprep.subr.bf16.mxu0 %v3114_v0 }
 0xecd   :  { %v911_v53 = vpop.f32.mrf.mxu0 }
 0xece   :  { %v912_v54 = vadd.f32 %v911_v53, %v868_v27  ;;  %v2412_v53 = vld [vmem:[%s3724_s0 + $0xc] sm:$0xf] }
 0xecf   :  { %v2657_v55 = vpop.f32.mrf.mxu0 }
 0xed0   :  { %v917_v56 = vadd.f32 %v3290_v46, %v912_v54 }
 0xed1   :  { %v914_v57 = vpop.f32.mrf.mxu0 }
 0xed2   :  { %2893 = vtanh.f32 %v917_v56  ;;  %v2411_v60 = vmul.f32 -1.442695, %v917_v56 }
 0xed3   :  { %v2658_v58 = vpop.f32.mrf.mxu0 }
 0xed4   :  { %2895 = vpow2.f32 %v2411_v60 }
 0xedf   :  { %v2894_v59 = vpop.eup %2893 }
 0xee0   :  { %927 = vrot.lane.b32.xlu0 %v2894_v59, %s3111_s20 }
 0xee1   :  { %v2896_v61 = vpop.eup %2895 }
 0xee2   :  { %v921_v62 = vadd.f32 1.0, %v2896_v61 }
 0xee4   :  { %2897 = vrcp.f32 %v921_v62 }
 0xef1   :  { %v2898_v5 = vpop.eup %2897 }
 0xef2   :  { %v925_v11 = vmul.f32 %v2898_v5, %v3349_v8 }
 0xf52   :  { %v928_v6 = vpop.permute.xlu0 %927 }
 0xf53   :  { %v930_v10 = vmul.f32 %v2898_v5, %v928_v6 }
 0xf55   :  { %932 = vrot.lane.b32.xlu1 %v930_v10, %s3116_s27 }
 0xfc7   :  { %v933_v13 = vpop.permute.xlu1 %932 }
 0xfc8   :  { %v3401_v14 = vadd.f32 %v933_v13, %v925_v11 }
 0xfca   :  { %2899 = vtanh.f32 %v3401_v14  ;;  %v947_v15 = vpack.c.bf16 %v3401_v14, %v3401_v14 }
 0xfd7   :  { %v2900_v63 = vpop.eup %2899 }
 0xfd8   :  { %938 = vrot.lane.b32.xlu0 %v2900_v63, %s3111_s20 }
 0xfdc   :  { %996 = vrot.lane.b32.xlu0 %v947_v15, %s3117_s28 }
0x104a   :  { %v939_v16 = vpop.permute.xlu0 %938 }
0x104b   :  { %v3408_v17 = vmul.f32 %v2898_v5, %v939_v16 }
0x104d   :  { %v946_v18 = vpack.c.bf16 %v3408_v17, %v3408_v17 }
0x104e   :  { %v997_v8 = vpop.permute.xlu0 %996 }
0x104f   :  { %949 = vrot.lane.b32.xlu1 %v946_v18, %s3116_s27  ;;  %2672 = vmatmul.mubr.msk.bf16.vlgmr.msra.gmra.mxu0 %vm113_vm2, %v997_v8 }
0x1050   :  { %2682 = vmatpush3.bf16.msra.mxu0 %v3252_v33  ;;  %2685 = vmatprep.mubr.msk.bf16.mxu0 %vm3115_vm1, %v3114_v0 }
0x1051   :  { %2683 = vmatprep.subr.bf16.mxu0 %v3114_v0 }
0x1054   :  { %2684 = vmatpush3.bf16.msra.mxu0 %v3263_v35 }
0x1055   :  { %2695 = vmatprep.subr.bf16.mxu0 %v3114_v0 }
0x10c1   :  { %v950_v19 = vpop.permute.xlu1 %949 }
0x10c2   :  { %2664 = vmatmul.mubr.msk.bf16.vlgmr.msra.gmra.mxu1 %vm113_vm2, %v950_v19  ;;  %2686 = vmatmul.mubr.msk.bf16.vlgmr.msra.gmra.mxu0 %vm113_vm2, %v950_v19 }
0x10c3   :  { %2676 = vmatpush3.bf16.msra.mxu1 %v3240_v9  ;;  %2677 = vmatprep.mubr.msk.bf16.mxu1 %vm3115_vm1, %v3114_v0 }
0x10c4   :  { %2689 = vmatprep.subr.bf16.mxu1 %v3114_v0  ;;  %2696 = vmatpush3.bf16.msra.mxu0 %v3205_v1 }
0x10c5   :  { %2697 = vmatprep.subr.bf16.mxu0 %v3114_v0  ;;  %2699 = vmatprep.mubr.msk.bf16.mxu0 %vm3115_vm1, %v3114_v0 }
0x10c8   :  { %2698 = vmatpush3.bf16.msra.mxu0 %v3216_v3 }
0x10c9   :  { %2711 = vmatprep.subr.bf16.mxu0 %v3114_v0 }
0x110f   :  { %v1035_v20 = vpop.f32.mrf.mxu0 }
0x1111   :  { %v2673_v21 = vpop.f32.mrf.mxu0 }
0x1113   :  { %v1038_v22 = vpop.f32.mrf.mxu0 }
0x1115   :  { %v2674_v23 = vpop.f32.mrf.mxu0 }
0x1182   :  { %v988_v25 = vpop.f32.mrf.mxu1  ;;  %v1134_v26 = vpop.f32.mrf.mxu0 }
0x1183   :  { %v994_v27 = vadd.f32 %v988_v25, %v945_v24 }
0x1184   :  { %v2665_v28 = vpop.f32.mrf.mxu1  ;;  %v2687_v29 = vpop.f32.mrf.mxu0 }
0x1185   :  { %v1041_v30 = vadd.f32 %v1035_v20, %v994_v27  ;;  %v1211_v29 = vld [vmem:[#allocation4 + $0x10] sm:$0xf] }
0x1186   :  { %v991_v31 = vpop.f32.mrf.mxu1  ;;  %v1137_v32 = vpop.f32.mrf.mxu0 }
0x1187   :  { %2901 = vtanh.f32 %v1041_v30 }
0x1188   :  { %v2666_v36 = vpop.f32.mrf.mxu1  ;;  %v2688_v37 = vpop.f32.mrf.mxu0 }
0x1194   :  { %v2902_v38 = vpop.eup %2901 }
0x1195   :  { %v1043_v39 = vpack.c.bf16 %v2902_v38, %v2902_v38 }
0x1197   :  { %2678 = vmatmul.mubr.msk.bf16.vlgmr.msra.gmra.mxu1 %vm222_vm3, %v1043_v39 }
0x1198   :  { %2690 = vmatpush3.bf16.msra.mxu1 %v3257_v34  ;;  %2691 = vmatprep.mubr.msk.bf16.mxu1 %vm3115_vm1, %v3114_v0 }
0x1199   :  { %2703 = vmatprep.subr.bf16.mxu1 %v3114_v0 }
0x1257   :  { %v1081_v40 = vpop.f32.mrf.mxu1 }
0x1258   :  { %v1087_v41 = vsel %vm266_vm4, %v1081_v40, -inf }
0x1259   :  { %1088 = vmax.xlane.f32.xlu1 %v1087_v41  ;;  %v2679_v42 = vpop.f32.mrf.mxu1 }
0x125b   :  { %v1084_v43 = vpop.f32.mrf.mxu1 }
0x125d   :  { %v2680_v44 = vpop.f32.mrf.mxu1 }
0x12e2   :  { %v1089_v45 = vpop.xlane.xlu1 %1088 }
0x12e3   :  { %v1090_v47 = vsub.f32 %v1081_v40, %v1089_v45 }
0x12e5   :  { %v1091_v48 = vmul.f32 1.442695, %v1090_v47 }
0x12e7   :  { %2903 = vpow2.f32 %v1091_v48 }
0x12f4   :  { %v2904_v49 = vpop.eup %2903 }
0x12f5   :  { %v1093_v50 = vsel %vm266_vm4, %v2904_v49, 0.0 }
0x12f6   :  { %1094 = vadd.xlane.f32.xlu0 %v1093_v50 }
0x137f   :  { %v1095_v51 = vpop.xlane.xlu0 %1094 }
0x1380   :  { %2905 = vrcp.f32 %v1095_v51 }
0x138d   :  { %v2906_v52 = vpop.eup %2905 }
0x138e   :  { %v1097_v54 = vmul.f32 %v2906_v52, %v2904_v49 }
0x1390   :  { %v1098_v55 = vmul.f32 %v2412_v53, %v1097_v54 }
0x1392   :  { %v1099_v56 = vpack.c.bf16 %v1098_v55, %v1098_v55 }
0x1394   :  { %2692 = vmatmul.mubr.msk.bf16.vlgmr.msra.gmra.mxu1 %vm222_vm3, %v1099_v56  ;;  %v2419_v56 = vld [vmem:[%s3724_s0 + $0x10] sm:$0xf] }
0x1395   :  { %2704 = vmatpush3.bf16.msra.mxu1 %v3210_v2  ;;  %2707 = vmatprep.mubr.msk.bf16.mxu1 %vm3115_vm1, %v3114_v0 }
0x1396   :  { %2705 = vmatprep.subr.bf16.mxu1 %v3114_v0 }
0x1399   :  { %2706 = vmatpush3.bf16.msra.mxu1 %v3223_v4 }
0x139a   :  { %2717 = vmatprep.subr.bf16.mxu1 %v3114_v0 }
0x1454   :  { %v1177_v57 = vpop.f32.mrf.mxu1 }
0x1455   :  { %v1178_v58 = vadd.f32 %v1177_v57, %v1134_v26 }
0x1456   :  { %v2693_v59 = vpop.f32.mrf.mxu1 }
0x1457   :  { %v1183_v60 = vadd.f32 %v3290_v46, %v1178_v58 }
0x1458   :  { %v1180_v61 = vpop.f32.mrf.mxu1 }
0x1459   :  { %2907 = vtanh.f32 %v1183_v60  ;;  %v2418_v6 = vmul.f32 -1.442695, %v1183_v60 }
0x145a   :  { %v2694_v62 = vpop.f32.mrf.mxu1 }
0x145b   :  { %2909 = vpow2.f32 %v2418_v6 }
0x1466   :  { %v2908_v5 = vpop.eup %2907 }
0x1467   :  { %1193 = vrot.lane.b32.xlu0 %v2908_v5, %s3111_s20 }
0x1468   :  { %v2910_v10 = vpop.eup %2909 }
0x1469   :  { %v1187_v11 = vadd.f32 1.0, %v2910_v10 }
0x146b   :  { %2911 = vrcp.f32 %v1187_v11 }
0x1478   :  { %v2912_v13 = vpop.eup %2911 }
0x1479   :  { %v1191_v16 = vmul.f32 %v2912_v13, %v3401_v14 }
0x14d9   :  { %v1194_v63 = vpop.permute.xlu0 %1193 }
0x14da   :  { %v1196_v15 = vmul.f32 %v2912_v13, %v1194_v63 }
0x14dc   :  { %1198 = vrot.lane.b32.xlu1 %v1196_v15, %s3116_s27 }
0x154e   :  { %v1199_v18 = vpop.permute.xlu1 %1198 }
0x154f   :  { %v3453_v8 = vadd.f32 %v1199_v18, %v1191_v16 }
0x1551   :  { %2913 = vtanh.f32 %v3453_v8  ;;  %v1213_v20 = vpack.c.bf16 %v3453_v8, %v3453_v8 }
0x155e   :  { %v2914_v19 = vpop.eup %2913 }
0x155f   :  { %1204 = vrot.lane.b32.xlu1 %v2914_v19, %s3111_s20 }
0x1563   :  { %1262 = vrot.lane.b32.xlu1 %v1213_v20, %s3117_s28 }
0x15d1   :  { %v1205_v21 = vpop.permute.xlu1 %1204 }
0x15d2   :  { %v3460_v22 = vmul.f32 %v2912_v13, %v1205_v21 }
0x15d4   :  { %v1212_v23 = vpack.c.bf16 %v3460_v22, %v3460_v22 }
0x15d5   :  { %v1263_v14 = vpop.permute.xlu1 %1262 }
0x15d6   :  { %1215 = vrot.lane.b32.xlu0 %v1212_v23, %s3116_s27  ;;  %2708 = vmatmul.mubr.msk.bf16.vlgmr.msra.gmra.mxu1 %vm113_vm2, %v1263_v14 }
0x15d7   :  { %2718 = vmatpush3.bf16.msra.mxu1 %v3252_v33  ;;  %2721 = vmatprep.mubr.msk.bf16.mxu1 %vm3115_vm1, %v3114_v0 }
0x15d8   :  { %2719 = vmatprep.subr.bf16.mxu1 %v3114_v0 }
0x15db   :  { %2720 = vmatpush3.bf16.msra.mxu1 %v3263_v35 }
0x15dc   :  { %2731 = vmatprep.subr.bf16.mxu1 %v3114_v0 }
0x1648   :  { %v1216_v24 = vpop.permute.xlu0 %1215 }
0x1649   :  { %2700 = vmatmul.mubr.msk.bf16.vlgmr.msra.gmra.mxu0 %vm113_vm2, %v1216_v24  ;;  %2722 = vmatmul.mubr.msk.bf16.vlgmr.msra.gmra.mxu1 %vm113_vm2, %v1216_v24 }
0x164a   :  { %2712 = vmatpush3.bf16.msra.mxu0 %v3240_v9  ;;  %2713 = vmatprep.mubr.msk.bf16.mxu0 %vm3115_vm1, %v3114_v0 }
0x164b   :  { %2725 = vmatprep.subr.bf16.mxu0 %v3114_v0  ;;  %2732 = vmatpush3.bf16.msra.mxu1 %v3205_v1 }
0x164c   :  { %2733 = vmatprep.subr.bf16.mxu1 %v3114_v0  ;;  %2735 = vmatprep.mubr.msk.bf16.mxu1 %vm3115_vm1, %v3114_v0 }
0x164f   :  { %2734 = vmatpush3.bf16.msra.mxu1 %v3216_v3 }
0x1650   :  { %2747 = vmatprep.subr.bf16.mxu1 %v3114_v0 }
0x1696   :  { %v1301_v25 = vpop.f32.mrf.mxu1 }
0x1698   :  { %v2709_v26 = vpop.f32.mrf.mxu1 }
0x169a   :  { %v1304_v27 = vpop.f32.mrf.mxu1 }
0x169c   :  { %v2710_v28 = vpop.f32.mrf.mxu1 }
0x1709   :  { %v1254_v30 = vpop.f32.mrf.mxu0  ;;  %v1400_v31 = vpop.f32.mrf.mxu1 }
0x170a   :  { %v1260_v32 = vadd.f32 %v1254_v30, %v1211_v29  ;;  %v1477_v30 = vld [vmem:[#allocation4 + $0x14] sm:$0xf] }
0x170b   :  { %v2701_v36 = vpop.f32.mrf.mxu0  ;;  %v2723_v37 = vpop.f32.mrf.mxu1 }
0x170c   :  { %v1307_v1 = vadd.f32 %v1301_v25, %v1260_v32 }
0x170d   :  { %v1257_v38 = vpop.f32.mrf.mxu0  ;;  %v1403_v39 = vpop.f32.mrf.mxu1 }
0x170e   :  { %2915 = vtanh.f32 %v1307_v1 }
0x170f   :  { %v2702_v40 = vpop.f32.mrf.mxu0  ;;  %v2724_v41 = vpop.f32.mrf.mxu1 }
0x171b   :  { %v2916_v42 = vpop.eup %2915 }
0x171c   :  { %v1309_v3 = vpack.c.bf16 %v2916_v42, %v2916_v42 }
0x171e   :  { %2714 = vmatmul.mubr.msk.bf16.vlgmr.msra.gmra.mxu0 %vm222_vm3, %v1309_v3 }
0x171f   :  { %2726 = vmatpush3.bf16.msra.mxu0 %v3257_v34  ;;  %2727 = vmatprep.mubr.msk.bf16.mxu0 %vm3115_vm1, %v3114_v0 }
0x1720   :  { %2739 = vmatprep.subr.bf16.mxu0 %v3114_v0 }
0x17de   :  { %v1347_v43 = vpop.f32.mrf.mxu0 }
0x17df   :  { %v1353_v44 = vsel %vm266_vm4, %v1347_v43, -inf }
0x17e0   :  { %1354 = vmax.xlane.f32.xlu0 %v1353_v44  ;;  %v2715_v45 = vpop.f32.mrf.mxu0 }
0x17e2   :  { %v1350_v47 = vpop.f32.mrf.mxu0 }
0x17e4   :  { %v2716_v48 = vpop.f32.mrf.mxu0 }
0x1869   :  { %v1355_v49 = vpop.xlane.xlu0 %1354 }
0x186a   :  { %v1356_v50 = vsub.f32 %v1347_v43, %v1355_v49 }
0x186c   :  { %v1357_v51 = vmul.f32 1.442695, %v1356_v50 }
0x186e   :  { %2917 = vpow2.f32 %v1357_v51 }
0x187b   :  { %v2918_v52 = vpop.eup %2917 }
0x187c   :  { %v1359_v53 = vsel %vm266_vm4, %v2918_v52, 0.0 }
0x187d   :  { %1360 = vadd.xlane.f32.xlu1 %v1359_v53 }
0x1906   :  { %v1361_v54 = vpop.xlane.xlu1 %1360 }
0x1907   :  { %2919 = vrcp.f32 %v1361_v54 }
0x1914   :  { %v2920_v55 = vpop.eup %2919 }
0x1915   :  { %v1363_v57 = vmul.f32 %v2920_v55, %v2918_v52 }
0x1917   :  { %v1364_v58 = vmul.f32 %v2419_v56, %v1363_v57  ;;  %v2426_v56 = vld [vmem:[%s3724_s0 + $0x14] sm:$0xf] }
0x1919   :  { %v1365_v59 = vpack.c.bf16 %v1364_v58, %v1364_v58 }
0x191b   :  { %2728 = vmatmul.mubr.msk.bf16.vlgmr.msra.gmra.mxu0 %vm222_vm3, %v1365_v59 }
0x191c   :  { %2740 = vmatpush3.bf16.msra.mxu0 %v3210_v2  ;;  %2743 = vmatprep.mubr.msk.bf16.mxu0 %vm3115_vm1, %v3114_v0 }
0x191d   :  { %2741 = vmatprep.subr.bf16.mxu0 %v3114_v0 }
0x1920   :  { %2742 = vmatpush3.bf16.msra.mxu0 %v3223_v4 }
0x1921   :  { %2753 = vmatprep.subr.bf16.mxu0 %v3114_v0 }
0x19db   :  { %v1443_v60 = vpop.f32.mrf.mxu0 }
0x19dc   :  { %v1444_v61 = vadd.f32 %v1443_v60, %v1400_v31  ;;  %v3560_v60 = vld [vmem:[%s3727_s3 + $0x8] sm:$0xff]  }
0x19dd   :  { %v2729_v62 = vpop.f32.mrf.mxu0 }
0x19de   :  { %v1449_v5 = vadd.f32 %v3290_v46, %v1444_v61  ;;  %v3569_v61 = vld [vmem:[%s3727_s3] sm:$0xff]  }
0x19df   :  { %v1446_v6 = vpop.f32.mrf.mxu0 }
0x19e0   :  { %2921 = vtanh.f32 %v1449_v5  ;;  %v2425_v2 = vmul.f32 -1.442695, %v1449_v5 }
0x19e1   :  { %v2730_v10 = vpop.f32.mrf.mxu0 }
0x19e2   :  { %2923 = vpow2.f32 %v2425_v2 }
0x19ed   :  { %v2922_v11 = vpop.eup %2921 }
0x19ee   :  { %1459 = vrot.lane.b32.xlu0 %v2922_v11, %s3111_s20 }
0x19ef   :  { %v2924_v13 = vpop.eup %2923 }
0x19f0   :  { %v1453_v63 = vadd.f32 1.0, %v2924_v13 }
0x19f2   :  { %2925 = vrcp.f32 %v1453_v63 }
0x19ff   :  { %v2926_v15 = vpop.eup %2925 }
0x1a00   :  { %v1457_v18 = vmul.f32 %v2926_v15, %v3453_v8 }
0x1a60   :  { %v1460_v4 = vpop.permute.xlu0 %1459 }
0x1a61   :  { %v1462_v16 = vmul.f32 %v2926_v15, %v1460_v4 }
0x1a63   :  { %1464 = vrot.lane.b32.xlu1 %v1462_v16, %s3116_s27 }
0x1ad5   :  { %v1465_v19 = vpop.permute.xlu1 %1464 }
0x1ad6   :  { %v3505_v20 = vadd.f32 %v1465_v19, %v1457_v18 }
0x1ad8   :  { %2927 = vtanh.f32 %v3505_v20  ;;  %v1479_v23 = vpack.c.bf16 %v3505_v20, %v3505_v20 }
0x1ae5   :  { %v2928_v21 = vpop.eup %2927 }
0x1ae6   :  { %1470 = vrot.lane.b32.xlu0 %v2928_v21, %s3111_s20 }
0x1aea   :  { %1528 = vrot.lane.b32.xlu0 %v1479_v23, %s3117_s28 }
0x1b58   :  { %v1471_v14 = vpop.permute.xlu0 %1470 }
0x1b59   :  { %v3512_v24 = vmul.f32 %v2926_v15, %v1471_v14 }
0x1b5b   :  { %v1478_v25 = vpack.c.bf16 %v3512_v24, %v3512_v24 }
0x1b5c   :  { %v1529_v8 = vpop.permute.xlu0 %1528 }
0x1b5d   :  { %1481 = vrot.lane.b32.xlu1 %v1478_v25, %s3116_s27  ;;  %2744 = vmatmul.mubr.msk.bf16.vlgmr.msra.gmra.mxu0 %vm113_vm2, %v1529_v8 }
0x1b5e   :  { %2754 = vmatpush3.bf16.msra.mxu0 %v3252_v33  ;;  %2757 = vmatprep.mubr.msk.bf16.mxu0 %vm3115_vm1, %v3114_v0  ;;  %v3533_v33 = vld [vmem:[%s3726_s2 + $0x8] sm:$0xff]  }
0x1b5f   :  { %2755 = vmatprep.subr.bf16.mxu0 %v3114_v0 }
0x1b62   :  { %2756 = vmatpush3.bf16.msra.mxu0 %v3263_v35 }
0x1b63   :  { %2767 = vmatprep.subr.bf16.mxu0 %v3114_v0 }
0x1bcf   :  { %v1482_v26 = vpop.permute.xlu1 %1481 }
0x1bd0   :  { %2736 = vmatmul.mubr.msk.bf16.vlgmr.msra.gmra.mxu1 %vm113_vm2, %v1482_v26  ;;  %2758 = vmatmul.mubr.msk.bf16.vlgmr.msra.gmra.mxu0 %vm113_vm2, %v1482_v26 }
0x1bd1   :  { %2748 = vmatpush3.bf16.msra.mxu1 %v3240_v9  ;;  %2749 = vmatprep.mubr.msk.bf16.mxu1 %vm3115_vm1, %v3114_v0  ;;  %v3542_v9 = vld [vmem:[%s3726_s2] sm:$0xff]  }
0x1bd2   :  { %2761 = vmatprep.subr.bf16.mxu1 %v3114_v0  ;;  %2768 = vmatpush3.bf16.msra.mxu0 %v3533_v33 }
0x1bd3   :  { %2769 = vmatprep.subr.bf16.mxu0 %v3114_v0  ;;  %2771 = vmatprep.mubr.msk.bf16.mxu0 %vm3115_vm1, %v3114_v0 }
0x1bd6   :  { %2770 = vmatpush3.bf16.msra.mxu0 %v3542_v9 }
0x1bd7   :  { %2783 = vmatprep.subr.bf16.mxu0 %v3114_v0 }
0x1c1d   :  { %v1567_v35 = vpop.f32.mrf.mxu0 }
0x1c1f   :  { %v2745_v27 = vpop.f32.mrf.mxu0 }
0x1c20   :  { %v3593_v27 = vld [vmem:[%s3730_s6 + $0x8] sm:$0xff]  }
0x1c21   :  { %v1570_v28 = vpop.f32.mrf.mxu0 }
0x1c22   :  { %v3602_v28 = vld [vmem:[%s3730_s6] sm:$0xff]  }
0x1c23   :  { %v2746_v29 = vpop.f32.mrf.mxu0 }
0x1c90   :  { %v1520_v31 = vpop.f32.mrf.mxu1  ;;  %v1666_v32 = vpop.f32.mrf.mxu0 }
0x1c91   :  { %v1526_v36 = vadd.f32 %v1520_v31, %v1477_v30  ;;  %v3608_v30 = vld [vmem:[#allocation7] sm:$0xff]  }
0x1c92   :  { %v2737_v37 = vpop.f32.mrf.mxu1  ;;  %v2759_v1 = vpop.f32.mrf.mxu0 }
0x1c93   :  { %v1573_v38 = vadd.f32 %v1567_v35, %v1526_v36  ;;  %v1743_v1 = vld [vmem:[#allocation4 + $0x18] sm:$0xf] }
0x1c94   :  { %v1523_v39 = vpop.f32.mrf.mxu1  ;;  %v1669_v40 = vpop.f32.mrf.mxu0 }
0x1c95   :  { %2929 = vtanh.f32 %v1573_v38 }
0x1c96   :  { %v2738_v41 = vpop.f32.mrf.mxu1  ;;  %v2760_v42 = vpop.f32.mrf.mxu0 }
0x1ca2   :  { %v2930_v3 = vpop.eup %2929 }
0x1ca3   :  { %v1575_v43 = vpack.c.bf16 %v2930_v3, %v2930_v3 }
0x1ca5   :  { %2750 = vmatmul.mubr.msk.bf16.vlgmr.msra.gmra.mxu1 %vm222_vm3, %v1575_v43 }
0x1ca6   :  { %2762 = vmatpush3.bf16.msra.mxu1 %v3257_v34  ;;  %2763 = vmatprep.mubr.msk.bf16.mxu1 %vm3115_vm1, %v3114_v0 }
0x1ca7   :  { %2775 = vmatprep.subr.bf16.mxu1 %v3114_v0 }
0x1d65   :  { %v1613_v44 = vpop.f32.mrf.mxu1 }
0x1d66   :  { %v1619_v45 = vsel %vm266_vm4, %v1613_v44, -inf }
0x1d67   :  { %1620 = vmax.xlane.f32.xlu1 %v1619_v45  ;;  %v2751_v47 = vpop.f32.mrf.mxu1 }
0x1d69   :  { %v1616_v48 = vpop.f32.mrf.mxu1 }
0x1d6a   :  { %v3624_v48 = vld [vmem:[%s3729_s5] sm:$0xff]  }
0x1d6b   :  { %v2752_v49 = vpop.f32.mrf.mxu1 }
0x1df0   :  { %v1621_v50 = vpop.xlane.xlu1 %1620 }
0x1df1   :  { %v1622_v51 = vsub.f32 %v1613_v44, %v1621_v50 }
0x1df3   :  { %v1623_v52 = vmul.f32 1.442695, %v1622_v51 }
0x1df5   :  { %2931 = vpow2.f32 %v1623_v52 }
0x1e02   :  { %v2932_v53 = vpop.eup %2931 }
0x1e03   :  { %v1625_v54 = vsel %vm266_vm4, %v2932_v53, 0.0 }
0x1e04   :  { %1626 = vadd.xlane.f32.xlu0 %v1625_v54 }
0x1e8d   :  { %v1627_v34 = vpop.xlane.xlu0 %1626 }
0x1e8e   :  { %2933 = vrcp.f32 %v1627_v34 }
0x1e9b   :  { %v2934_v55 = vpop.eup %2933 }
0x1e9c   :  { %v1629_v57 = vmul.f32 %v2934_v55, %v2932_v53 }
0x1e9e   :  { %v1630_v58 = vmul.f32 %v2426_v56, %v1629_v57 }
0x1ea0   :  { %v1631_v59 = vpack.c.bf16 %v1630_v58, %v1630_v58 }
0x1ea2   :  { %2764 = vmatmul.mubr.msk.bf16.vlgmr.msra.gmra.mxu1 %vm222_vm3, %v1631_v59 }
0x1ea3   :  { %2776 = vmatpush3.bf16.msra.mxu1 %v3560_v60  ;;  %2779 = vmatprep.mubr.msk.bf16.mxu1 %vm3115_vm1, %v3114_v0 }
0x1ea4   :  { %2777 = vmatprep.subr.bf16.mxu1 %v3114_v0 }
0x1ea7   :  { %2778 = vmatpush3.bf16.msra.mxu1 %v3569_v61 }
0x1ea8   :  { %2789 = vmatprep.subr.bf16.mxu1 %v3114_v0 }
0x1f62   :  { %v1709_v62 = vpop.f32.mrf.mxu1 }
0x1f63   :  { %v1710_v5 = vadd.f32 %v1709_v62, %v1666_v32  ;;  %v2433_v62 = vld [vmem:[%s3724_s0 + $0x18] sm:$0xf] }
0x1f64   :  { %v2765_v6 = vpop.f32.mrf.mxu1 }
0x1f65   :  { %v1715_v10 = vadd.f32 %v3290_v46, %v1710_v5 }
0x1f66   :  { %v1712_v11 = vpop.f32.mrf.mxu1 }
0x1f67   :  { %2935 = vtanh.f32 %v1715_v10  ;;  %v2432_v63 = vmul.f32 -1.442695, %v1715_v10 }
0x1f68   :  { %v2766_v2 = vpop.f32.mrf.mxu1 }
0x1f69   :  { %2937 = vpow2.f32 %v2432_v63  ;;  %v3645_v63 = vld [vmem:[%s3731_s7] ss:$0 sm:$0xff] }
0x1f74   :  { %v2936_v13 = vpop.eup %2935 }
0x1f75   :  { %1725 = vrot.lane.b32.xlu0 %v2936_v13, %s3111_s20 }
0x1f76   :  { %v2938_v15 = vpop.eup %2937 }
0x1f77   :  { %v1719_v4 = vadd.f32 1.0, %v2938_v15 }
0x1f79   :  { %2939 = vrcp.f32 %v1719_v4 }
0x1f86   :  { %v2940_v16 = vpop.eup %2939 }
0x1f87   :  { %v1723_v21 = vmul.f32 %v2940_v16, %v3505_v20 }
0x1fe7   :  { %v1726_v18 = vpop.permute.xlu0 %1725 }
0x1fe8   :  { %v1728_v19 = vmul.f32 %v2940_v16, %v1726_v18 }
0x1fea   :  { %1730 = vrot.lane.b32.xlu1 %v1728_v19, %s3116_s27 }
0x205c   :  { %v1731_v23 = vpop.permute.xlu1 %1730 }
0x205d   :  { %v3577_v46 = vadd.f32 %v1731_v23, %v1723_v21 }
0x205f   :  { %2941 = vtanh.f32 %v3577_v46  ;;  %v1745_v25 = vpack.c.bf16 %v3577_v46, %v3577_v46 }
0x206c   :  { %v2942_v14 = vpop.eup %2941 }
0x206d   :  { %1736 = vrot.lane.b32.xlu1 %v2942_v14, %s3111_s20 }
0x2071   :  { %1794 = vrot.lane.b32.xlu1 %v1745_v25, %s3117_s28 }
0x20df   :  { %v1737_v8 = vpop.permute.xlu1 %1736 }
0x20e0   :  { %v3584_v26 = vmul.f32 %v2940_v16, %v1737_v8 }
0x20e2   :  { %v1744_v35 = vpack.c.bf16 %v3584_v26, %v3584_v26 }
0x20e3   :  { %v1795_v20 = vpop.permute.xlu1 %1794 }
0x20e4   :  { %1747 = vrot.lane.b32.xlu0 %v1744_v35, %s3116_s27  ;;  %2780 = vmatmul.mubr.msk.bf16.vlgmr.msra.gmra.mxu1 %vm113_vm2, %v1795_v20 }
0x20e5   :  { %2790 = vmatpush3.bf16.msra.mxu1 %v3593_v27  ;;  %2793 = vmatprep.mubr.msk.bf16.mxu1 %vm3115_vm1, %v3114_v0 }
0x20e6   :  { %2791 = vmatprep.subr.bf16.mxu1 %v3114_v0 }
0x20e9   :  { %2792 = vmatpush3.bf16.msra.mxu1 %v3602_v28 }
0x20ea   :  { %2803 = vmatprep.subr.bf16.mxu1 %v3114_v0 }
0x2156   :  { %v1748_v29 = vpop.permute.xlu0 %1747 }
0x2157   :  { %2772 = vmatmul.mubr.msk.bf16.vlgmr.msra.gmra.mxu0 %vm113_vm2, %v1748_v29  ;;  %2794 = vmatmul.mubr.msk.bf16.vlgmr.msra.gmra.mxu1 %vm113_vm2, %v1748_v29 }
0x2158   :  { %2784 = vmatpush3.bf16.msra.mxu0 %v3608_v30  ;;  %2785 = vmatprep.mubr.msk.bf16.mxu0 %vm3115_vm1, %v3114_v0 }
0x2159   :  { %2797 = vmatprep.subr.bf16.mxu0 %v3114_v0  ;;  %2804 = vmatpush3.bf16.msra.mxu1 %v3533_v33 }
0x215a   :  { %2805 = vmatprep.subr.bf16.mxu1 %v3114_v0  ;;  %2807 = vmatprep.mubr.msk.bf16.mxu1 %vm3115_vm1, %v3114_v0 }
0x215d   :  { %2806 = vmatpush3.bf16.msra.mxu1 %v3542_v9 }
0x215e   :  { %2819 = vmatprep.subr.bf16.mxu1 %v3114_v0 }
0x21a4   :  { %v1833_v31 = vpop.f32.mrf.mxu1 }
0x21a6   :  { %v2781_v32 = vpop.f32.mrf.mxu1 }
0x21a8   :  { %v1836_v36 = vpop.f32.mrf.mxu1 }
0x21aa   :  { %v2782_v37 = vpop.f32.mrf.mxu1 }
0x2217   :  { %v1786_v38 = vpop.f32.mrf.mxu0  ;;  %v1932_v39 = vpop.f32.mrf.mxu1 }
0x2218   :  { %v1792_v40 = vadd.f32 %v1786_v38, %v1743_v1 }
0x2219   :  { %v2773_v41 = vpop.f32.mrf.mxu0  ;;  %v2795_v42 = vpop.f32.mrf.mxu1 }
0x221a   :  { %v1839_v33 = vadd.f32 %v1833_v31, %v1792_v40  ;;  %v2009_v40 = vld [vmem:[#allocation4 + $0x1c] sm:$0xf] }
0x221b   :  { %v1789_v3 = vpop.f32.mrf.mxu0  ;;  %v1935_v43 = vpop.f32.mrf.mxu1 }
0x221c   :  { %2943 = vtanh.f32 %v1839_v33 }
0x221d   :  { %v2774_v44 = vpop.f32.mrf.mxu0  ;;  %v2796_v45 = vpop.f32.mrf.mxu1 }
0x2229   :  { %v2944_v47 = vpop.eup %2943 }
0x222a   :  { %v1841_v9 = vpack.c.bf16 %v2944_v47, %v2944_v47 }
0x222c   :  { %2786 = vmatmul.mubr.msk.bf16.vlgmr.msra.gmra.mxu0 %vm222_vm3, %v1841_v9 }
0x222d   :  { %2798 = vmatpush3.bf16.msra.mxu0 %v3624_v48  ;;  %2799 = vmatprep.mubr.msk.bf16.mxu0 %vm3115_vm1, %v3114_v0 }
0x222e   :  { %2811 = vmatprep.subr.bf16.mxu0 %v3114_v0 }
0x22ec   :  { %v1879_v49 = vpop.f32.mrf.mxu0 }
0x22ed   :  { %v1885_v50 = vsel %vm266_vm4, %v1879_v49, -inf }
0x22ee   :  { %1886 = vmax.xlane.f32.xlu0 %v1885_v50  ;;  %v2787_v51 = vpop.f32.mrf.mxu0 }
0x22f0   :  { %v1882_v52 = vpop.f32.mrf.mxu0 }
0x22f2   :  { %v2788_v53 = vpop.f32.mrf.mxu0 }
0x2377   :  { %v1887_v54 = vpop.xlane.xlu0 %1886 }
0x2378   :  { %v1888_v34 = vsub.f32 %v1879_v49, %v1887_v54 }
0x237a   :  { %v1889_v55 = vmul.f32 1.442695, %v1888_v34 }
0x237c   :  { %2945 = vpow2.f32 %v1889_v55 }
0x2389   :  { %v2946_v56 = vpop.eup %2945 }
0x238a   :  { %v1891_v57 = vsel %vm266_vm4, %v2946_v56, 0.0 }
0x238b   :  { %1892 = vadd.xlane.f32.xlu1 %v1891_v57 }
0x2414   :  { %v1893_v58 = vpop.xlane.xlu1 %1892 }
0x2415   :  { %2947 = vrcp.f32 %v1893_v58 }
0x2422   :  { %v2948_v59 = vpop.eup %2947 }
0x2423   :  { %v1895_v5 = vmul.f32 %v2948_v59, %v2946_v56 }
0x2425   :  { %v1896_v6 = vmul.f32 %v2433_v62, %v1895_v5 }
0x2427   :  { %v1897_v10 = vpack.c.bf16 %v1896_v6, %v1896_v6 }
0x2429   :  { %2800 = vmatmul.mubr.msk.bf16.vlgmr.msra.gmra.mxu0 %vm222_vm3, %v1897_v10 }
0x242a   :  { %2812 = vmatpush3.bf16.msra.mxu0 %v3560_v60  ;;  %2815 = vmatprep.mubr.msk.bf16.mxu0 %vm3115_vm1, %v3114_v0 }
0x242b   :  { %2813 = vmatprep.subr.bf16.mxu0 %v3114_v0 }
0x242e   :  { %2814 = vmatpush3.bf16.msra.mxu0 %v3569_v61 }
0x242f   :  { %2825 = vmatprep.subr.bf16.mxu0 %v3114_v0 }
0x24e9   :  { %v1975_v11 = vpop.f32.mrf.mxu0 }
0x24ea   :  { %v1976_v2 = vadd.f32 %v1975_v11, %v1932_v39 }
0x24eb   :  { %v2801_v13 = vpop.f32.mrf.mxu0 }
0x24ec   :  { %v1981_v15 = vadd.f32 %v3645_v63, %v1976_v2 }
0x24ed   :  { %v1978_v60 = vpop.f32.mrf.mxu0 }
0x24ee   :  { %2949 = vtanh.f32 %v1981_v15  ;;  %v2439_v18 = vmul.f32 -1.442695, %v1981_v15 }
0x24ef   :  { %v2802_v4 = vpop.f32.mrf.mxu0 }
0x24f0   :  { %2951 = vpow2.f32 %v2439_v18 }
0x24fb   :  { %v2950_v16 = vpop.eup %2949 }
0x24fc   :  { %1991 = vrot.lane.b32.xlu0 %v2950_v16, %s3111_s20 }
0x24fd   :  { %v2952_v61 = vpop.eup %2951 }
0x24fe   :  { %v1985_v19 = vadd.f32 1.0, %v2952_v61 }
0x2500   :  { %2953 = vrcp.f32 %v1985_v19 }
0x250d   :  { %v2954_v21 = vpop.eup %2953 }
0x250e   :  { %v1989_v25 = vmul.f32 %v2954_v21, %v3577_v46 }
0x256e   :  { %v1992_v23 = vpop.permute.xlu0 %1991 }
0x256f   :  { %v1994_v14 = vmul.f32 %v2954_v21, %v1992_v23 }
0x2571   :  { %1996 = vrot.lane.b32.xlu1 %v1994_v14, %s3116_s27 }
0x25e3   :  { %v1997_v8 = vpop.permute.xlu1 %1996 }
0x25e4   :  { %v3651_v35 = vadd.f32 %v1997_v8, %v1989_v25 }
0x25e6   :  { %2955 = vtanh.f32 %v3651_v35  ;;  %v2011_v29 = vpack.c.bf16 %v3651_v35, %v3651_v35 }
0x25f3   :  { %v2956_v20 = vpop.eup %2955 }
0x25f4   :  { %2002 = vrot.lane.b32.xlu0 %v2956_v20, %s3111_s20 }
0x25f8   :  { %2060 = vrot.lane.b32.xlu0 %v2011_v29, %s3117_s28 }
0x2666   :  { %v2003_v31 = vpop.permute.xlu0 %2002 }
0x2667   :  { %v3658_v32 = vmul.f32 %v2954_v21, %v2003_v31 }
0x2669   :  { %v2010_v36 = vpack.c.bf16 %v3658_v32, %v3658_v32 }
0x266a   :  { %v2061_v46 = vpop.permute.xlu0 %2060 }
0x266b   :  { %2013 = vrot.lane.b32.xlu1 %v2010_v36, %s3116_s27  ;;  %2816 = vmatmul.mubr.msk.bf16.vlgmr.msra.gmra.mxu0 %vm113_vm2, %v2061_v46 }
0x266c   :  { %2826 = vmatpush3.bf16.msra.mxu0 %v3593_v27  ;;  %2829 = vmatprep.mubr.msk.bf16.mxu0 %vm3115_vm1, %v3114_v0 }
0x266d   :  { %2827 = vmatprep.subr.bf16.mxu0 %v3114_v0 }
0x2670   :  { %2828 = vmatpush3.bf16.msra.mxu0 %v3602_v28 }
0x26dd   :  { %v2014_v37 = vpop.permute.xlu1 %2013 }
0x26de   :  { %2808 = vmatmul.mubr.msk.bf16.vlgmr.msra.gmra.mxu1 %vm113_vm2, %v2014_v37  ;;  %2830 = vmatmul.mubr.msk.bf16.vlgmr.msra.gmra.mxu0 %vm113_vm2, %v2014_v37 }
0x26df   :  { %2820 = vmatpush3.bf16.msra.mxu1 %v3608_v30  ;;  %2821 = vmatprep.mubr.msk.bf16.mxu1 %vm3115_vm1, %v3114_v0 }
0x26e0   :  { %2833 = vmatprep.subr.bf16.mxu1 %v3114_v0 }
0x272b   :  { %v2099_v27 = vpop.f32.mrf.mxu0 }
0x272d   :  { %v2817_v1 = vpop.f32.mrf.mxu0 }
0x272f   :  { %v2102_v38 = vpop.f32.mrf.mxu0 }
0x2731   :  { %v2818_v39 = vpop.f32.mrf.mxu0 }
0x279e   :  { %v2052_v41 = vpop.f32.mrf.mxu1  ;;  %v2198_v42 = vpop.f32.mrf.mxu0 }
0x279f   :  { %v2058_v28 = vadd.f32 %v2052_v41, %v2009_v40 }
0x27a0   :  { %v2809_v33 = vpop.f32.mrf.mxu1  ;;  %v2831_v3 = vpop.f32.mrf.mxu0 }
0x27a1   :  { %v2105_v43 = vadd.f32 %v2099_v27, %v2058_v28 }
0x27a2   :  { %v2055_v44 = vpop.f32.mrf.mxu1  ;;  %v2201_v45 = vpop.f32.mrf.mxu0 }
0x27a3   :  { %2957 = vtanh.f32 %v2105_v43 }
0x27a4   :  { %v2810_v30 = vpop.f32.mrf.mxu1  ;;  %v2832_v47 = vpop.f32.mrf.mxu0 }
0x27b0   :  { %v2958_v9 = vpop.eup %2957 }
0x27b1   :  { %v2107_v49 = vpack.c.bf16 %v2958_v9, %v2958_v9 }
0x27b3   :  { %2822 = vmatmul.mubr.msk.bf16.vlgmr.msra.gmra.mxu1 %vm222_vm3, %v2107_v49 }
0x27b4   :  { %2834 = vmatpush3.bf16.msra.mxu1 %v3624_v48  ;;  %2835 = vmatprep.mubr.msk.bf16.mxu1 %vm3115_vm1, %v3114_v0  ;;  %v2440_v0 = vld [vmem:[%s3724_s0 + $0x1c] sm:$0xf]  ;;  %s3118_s0 = smov [#allocation13]  }
0x27b5   :  { %s2362_s15 = sshll.u32 %s3118_s0, 4  ;;  %s2363_s15 = int_to_ptr.vmem [resolvable:$true] %s2362_s15 }
0x27b6   :  { %s3020_s16 = scalar_lea.vmem %s2363_s15, 64  ;;  %p3025_p11 = scmp.lt.s32.totalorder %s2363_s15, %s2363_s15 }
0x27b7   :  { %p3021_p10 = scmp.ne.s32.totalorder %s2363_s15, %s3020_s16  ;;  %p3026_p12 = scmp.lt.s32.totalorder %s3020_s16, %s3020_s16 }
0x27b9   :  { %p3027_p13 = por %p3026_p12, %p3025_p11 }
0x27bb   :  { %p3028_p0 = pnand %p3027_p13, %p3021_p10 }
0x2873   :  { %v2145_v50 = vpop.f32.mrf.mxu1 }
0x2874   :  { %v2151_v51 = vsel %vm266_vm4, %v2145_v50, -inf }
0x2875   :  { %2152 = vmax.xlane.f32.xlu1 %v2151_v51  ;;  %v2823_v52 = vpop.f32.mrf.mxu1 }
0x2877   :  { %v2148_v53 = vpop.f32.mrf.mxu1 }
0x2879   :  { %v2824_v54 = vpop.f32.mrf.mxu1 }
0x28fe   :  { %v2153_v34 = vpop.xlane.xlu1 %2152 }
0x28ff   :  { %v2154_v55 = vsub.f32 %v2145_v50, %v2153_v34 }
0x2901   :  { %v2155_v56 = vmul.f32 1.442695, %v2154_v55 }
0x2903   :  { %2959 = vpow2.f32 %v2155_v56 }
0x2910   :  { %v2960_v57 = vpop.eup %2959 }
0x2911   :  { %v2157_v58 = vsel %vm266_vm4, %v2960_v57, 0.0 }
0x2912   :  { %2158 = vadd.xlane.f32.xlu0 %v2157_v58 }
0x299b   :  { %v2159_v59 = vpop.xlane.xlu0 %2158 }
0x299c   :  { %2961 = vrcp.f32 %v2159_v59 }
0x29a9   :  { %v2962_v48 = vpop.eup %2961 }
0x29aa   :  { %v2161_v62 = vmul.f32 %v2962_v48, %v2960_v57 }
0x29ac   :  { %v2162_v5 = vmul.f32 %v2440_v0, %v2161_v62  ;;  %2325 = vst.msk [vmem:[#allocation13] sm:$0xf] %vm266_vm4, %v2161_v62 }
0x29ae   :  { %v2163_v6 = vpack.c.bf16 %v2162_v5, %v2162_v5 }
0x29b0   :  { %2836 = vmatmul.mubr.msk.bf16.vlgmr.msra.gmra.mxu1 %vm222_vm3, %v2163_v6 }
0x2a70   :  { %v2241_v10 = vpop.f32.mrf.mxu1 }
0x2a71   :  { %v2242_v11 = vadd.f32 %v2241_v10, %v2198_v42 }
0x2a72   :  { %v2837_v2 = vpop.f32.mrf.mxu1 }
0x2a73   :  { %v2247_v13 = vadd.f32 %v3645_v63, %v2242_v11 }
0x2a74   :  { %v2244_v15 = vpop.f32.mrf.mxu1 }
0x2a75   :  { %2963 = vtanh.f32 %v2247_v13  ;;  %v2446_v16 = vmul.f32 -1.442695, %v2247_v13 }
0x2a76   :  { %v2838_v60 = vpop.f32.mrf.mxu1 }
0x2a77   :  { %2965 = vpow2.f32 %v2446_v16 }
0x2a82   :  { %v2964_v4 = vpop.eup %2963 }
0x2a83   :  { %2257 = vrot.lane.b32.xlu0 %v2964_v4, %s3111_s20 }
0x2a84   :  { %v2966_v18 = vpop.eup %2965 }
0x2a85   :  { %v2251_v61 = vadd.f32 1.0, %v2966_v18 }
0x2a87   :  { %2284 = vrot.lane.b32.xlu0 %v3301_v7, %s3116_s27  ;;  %2967 = vrcp.f32 %v2251_v61 }
0x2a8b   :  { %2296 = vrot.lane.b32.xlu0 %v3512_v24, %s3116_s27 }
0x2a8f   :  { %2292 = vrot.lane.b32.xlu0 %v3408_v17, %s3117_s28 }
0x2a94   :  { %v2968_v63 = vpop.eup %2967 }
0x2a95   :  { %v2255_v23 = vmul.f32 %v2968_v63, %v3651_v35 }
0x2af5   :  { %v2258_v19 = vpop.permute.xlu0 %2257 }
0x2af6   :  { %v2260_v21 = vmul.f32 %v2968_v63, %v2258_v19 }
0x2af8   :  { %2262 = vrot.lane.b32.xlu1 %v2260_v21, %s3116_s27 }
0x2b6a   :  { %v2263_v14 = vpop.permute.xlu1 %2262 }
0x2b6b   :  { %v2265_v7 = vadd.f32 %v2263_v14, %v2255_v23 }
0x2b6d   :  { %2969 = vtanh.f32 %v2265_v7 }
0x2b7a   :  { %v2970_v25 = vpop.eup %2969 }
0x2b7b   :  { %2268 = vrot.lane.b32.xlu1 %v2970_v25, %s3111_s20 }
0x2b7f   :  { %2288 = vrot.lane.b32.xlu1 %v3353_v12, %s3111_s20 }
0x2b83   :  { %2300 = vrot.lane.b32.xlu1 %v3584_v26, %s3111_s20 }
0x2b87   :  { %2304 = vrot.lane.b32.xlu1 %v3658_v32, %s3117_s28 }
0x2b8b   :  { %2279 = vrot.lane.b32.xlu1 %v2265_v7, %s3117_s28 }
0x2b8c   :  { %3031 = shalt.err (!%p3028_p0)
}
0x2b8d   :  { %2365 = dma.vmem_to_hbm [thread:$0]  %s2363_s15, 64, %s3735_s11, [#allocation14]   ;;  %v2285_v12 = vpop.permute.xlu0 %2284  ;;  %vm2308_vm5 = vcmask 523264   ;;  %vm2310_vm6 = vcmask 785408  }
0x2b8e   :  { %s3119_s20 = smov [#allocation9]  }
0x2b8f   :  { %s2332_s28 = sshll.u32 %s3119_s20, 4  ;;  %s2333_s28 = int_to_ptr.vmem [resolvable:$true] %s2332_s28 }
0x2b90   :  { %s3040_s11 = scalar_lea.vmem %s2333_s28, 128  ;;  %p3045_p2 = scmp.lt.s32.totalorder %s2333_s28, %s2333_s28 }
0x2b91   :  { %v2297_v26 = vpop.permute.xlu0 %2296  ;;  %p3041_p1 = scmp.ne.s32.totalorder %s2333_s28, %s3040_s11  ;;  %p3046_p3 = scmp.lt.s32.totalorder %s3040_s11, %s3040_s11 }
0x2b93   :  { %p3047_p4 = por %p3046_p3, %p3045_p2 }
0x2b95   :  { %v2293_v29 = vpop.permute.xlu0 %2292  ;;  %p3048_p5 = pnand %p3047_p4, %p3041_p1 }
0x2bed   :  { %v2269_v17 = vpop.permute.xlu1 %2268 }
0x2bee   :  { %v2271_v24 = vmul.f32 %v2968_v63, %v2269_v17 }
0x2bf0   :  { %2273 = vrot.lane.b32.xlu0 %v2271_v24, %s3116_s27 }
0x2bf1   :  { %v2289_v8 = vpop.permute.xlu1 %2288 }
0x2bf2   :  { %v2307_v35 = vsel %vm113_vm2, %v2285_v12, %v2289_v8 }
0x2bf3   :  { %v2309_v31 = vsel %vm2308_vm5, %v2307_v35, %v2293_v29 }
0x2bf4   :  { %v2311_v27 = vsel %vm2310_vm6, %v2309_v31, %v3460_v22 }
0x2bf5   :  { %v2301_v20 = vpop.permute.xlu1 %2300 }
0x2bf6   :  { %v2312_v32 = vsel %vm113_vm2, %v2297_v26, %v2301_v20 }
0x2bf9   :  { %v2305_v36 = vpop.permute.xlu1 %2304 }
0x2bfa   :  { %v2313_v46 = vsel %vm2308_vm5, %v2312_v32, %v2305_v36 }
0x2bfb   :  { %v2314_v37 = vsel %vm2310_vm6, %v2313_v46, %v2271_v24 }
0x2bfc   :  { %v2317_v1 = vcombine.low %v2311_v27, %v2314_v37 }
0x2bfd   :  { %v2280_v38 = vpop.permute.xlu1 %2279 }
0x2bfe   :  { %2282 = vst.msk [vmem:[#allocation3] sm:$0xf] %vm69_vm0, %v2280_v38  ;;  %2324 = vst.msk [vmem:[#allocation12] sm:$0xf] %vm69_vm0, %v2280_v38 }
0x2bff   :  { %2319 = vst [vmem:[#allocation9] sm:$0xff] %v2317_v1 }
0x2c00   :  { %3051 = shalt.err (!%p3048_p5)
}
0x2c01   :  { %2335 = dma.vmem_to_hbm [thread:$0]  %s2333_s28, 128, %s3732_s8, [#allocation6]  }
0x2c02   :  { %s3120_s2 = smov [#allocation10]   ;;  %s3121_s22 = smov [#allocation12]  }
0x2c03   :  { %s2342_s21 = sshll.u32 %s3120_s2, 4  ;;  %s2352_s23 = sshll.u32 %s3121_s22, 4  ;;  %s2343_s21 = int_to_ptr.vmem [resolvable:$true] %s2342_s21  ;;  %s2353_s23 = int_to_ptr.vmem [resolvable:$true] %s2352_s23 }
0x2c04   :  { %s3060_s24 = scalar_lea.vmem %s2343_s21, 64  ;;  %p3065_p7 = scmp.lt.s32.totalorder %s2343_s21, %s2343_s21 }
0x2c05   :  { %p3061_p6 = scmp.ne.s32.totalorder %s2343_s21, %s3060_s24  ;;  %p3066_p8 = scmp.lt.s32.totalorder %s3060_s24, %s3060_s24 }
0x2c07   :  { %p3067_p9 = por %p3066_p8, %p3065_p7 }
0x2c09   :  { %p3068_p10 = pnand %p3067_p9, %p3061_p6 }
0x2c62   :  { %v2274_v22 = vpop.permute.xlu0 %2273 }
0x2c63   :  { %2277 = vst.msk [vmem:[#allocation2] sm:$0xf] %vm69_vm0, %v2274_v22  ;;  %2323 = vst.msk [vmem:[#allocation10] sm:$0xf] %vm69_vm0, %v2274_v22 }
0x2c64   :  { %3071 = shalt.err (!%p3068_p10)
}
0x2c65   :  { %2345 = dma.vmem_to_hbm [thread:$0]  %s2343_s21, 64, %s3733_s9, [#allocation11]  }
0x2c66   :  { %s3080_s3 = scalar_lea.vmem %s2353_s23, 64  ;;  %p3085_p12 = scmp.lt.s32.totalorder %s2353_s23, %s2353_s23 }
0x2c67   :  { %p3081_p11 = scmp.ne.s32.totalorder %s2353_s23, %s3080_s3  ;;  %p3086_p13 = scmp.lt.s32.totalorder %s3080_s3, %s3080_s3 }
0x2c69   :  { %p3087_p0 = por %p3086_p13, %p3085_p12 }
0x2c6b   :  { %p3088_p1 = pnand %p3087_p0, %p3081_p11 }
0x2c6d   :  { %3091 = shalt.err (!%p3088_p1)
}
0x2c6e   :  { %2355 = dma.vmem_to_hbm [thread:$0]  %s2353_s23, 64, %s3734_s10, [#allocation11]  }
0x2c6f   :  { %3104 = dma.done.wait [#allocation6], 128  }
0x2c70   :  { %3105 = vsyncadd [#allocation6], 4294967168 }
0x2c71   :  { %3106 = dma.done.wait [#allocation11], 128  }
0x2c72   :  { %3107 = vsyncadd [#allocation11], 4294967168 }
0x2c73   :  { %3108 = dma.done.wait [#allocation14], 64  }
0x2c74   :  { %3109 = vsyncadd [#allocation14], 4294967232 }
0x2c75   :  { %2378 = vsyncpa [#allocation5], 1 }
0x2c76   :  { %2379 = vsyncpa [#allocation8], 1 }
0x2c77   :  { %2380 = vsyncpa [#allocation6], 1 }
0x2c78   :  { %2381 = vsyncpa [#allocation11], 1 }
0x2c79   :  { %2382 = vsyncpa [#allocation14], 1 }

</bundles_post_ra>
